<compile_context>
chip_gen: v6e
topology: v6e:2x2x1
jax: 0.10.0
libtpu: 0.0.40
codegen_flags: <defaults>
</compile_context>

<pallas_src>
import functools

import jax
import jax.numpy as jnp
from jax.experimental import pallas as pl
from jax.experimental.pallas import tpu as pltpu


def _topk_sim_kernel(xn_ref, q_ref, idx_out_ref, vals_scr, idx_scr, *, topk,
                     use_bf16_matmul):
    """Streaming cosine-similarity top-k over queue tiles.

    xn_ref      : (TB, D) f32   pre-normalized query block (normalized in wrapper)
    q_ref       : (TS, D)       queue tile (native dtype, normalized here)
    idx_out_ref : (TB, K) i32   global top-k indices (written at last S step)
    vals_scr    : (TB, K) f32   running top-k values (descending)
    idx_scr     : (TB, K) i32   running top-k global indices
    """
    s = pl.program_id(1)
    num_s = pl.num_programs(1)
    neg_inf = jnp.float32(-jnp.inf)
    eps_sq = jnp.float32(1e-24)  # sqrt(1e-24) = 1e-12 == F.normalize eps

    @pl.when(s == 0)
    def _init():
        vals_scr[...] = jnp.full(vals_scr.shape, neg_inf, jnp.float32)
        idx_scr[...] = jnp.zeros(idx_scr.shape, jnp.int32)

    # Normalize only this queue tile (rsqrt -> EUP slot); never the full queue.
    qf = q_ref[...].astype(jnp.float32)
    qinv = jax.lax.rsqrt(
        jnp.maximum(jnp.sum(qf * qf, axis=-1, keepdims=True), eps_sq))
    qn = qf * qinv
    xn = xn_ref[...]
    if use_bf16_matmul:
        # bf16-native MXU path (v6e/v7x); may reorder near-tied indices.
        qn = qn.astype(jnp.bfloat16)
        xn = xn.astype(jnp.bfloat16)

    # (TB, TS): contract last dims of both operands -> no transpose of qn.
    sim = jax.lax.dot_general(
        xn, qn, (((1,), (1,)), ((), ())), preferred_element_type=jnp.float32)

    tb, ts = sim.shape
    base = s * ts  # global queue-row offset of this tile

    # Process the tile in 128-lane segments: all per-k merge work (argmax,
    # position find, consume-select) runs on a (TB, <=128) slice instead of the
    # full (TB, TS) tile.  Lane-aligned slices at 128 boundaries are free.
    seg_w = 128 if ts % 128 == 0 else ts
    num_seg = ts // seg_w
    num_k = vals_scr.shape[1]

    run_v = vals_scr[...]                                           # (TB, K)
    run_i = idx_scr[...]                                            # (TB, K)
    # Hoisted iotas (JAX does not CSE broadcast_in_dim).
    k_col = jax.lax.broadcasted_iota(jnp.int32, (tb, num_k), 1)     # (TB, K)
    l_col = jax.lax.broadcasted_iota(jnp.int32, (tb, seg_w), 1)     # (TB, W)

    for g in range(num_seg):
        work = sim[:, g * seg_w:(g + 1) * seg_w]                    # (TB, W)
        gbase = base + g * seg_w

        new_v = jnp.full((tb, num_k), neg_inf, jnp.float32)
        new_i = jnp.zeros((tb, num_k), jnp.int32)

        # topk is small & static -> unrolled exact merge of {running} U {segment}.
        # NOTE: NaN similarities would break the max/compare selection (same
        # caveat as the torch reference near NaN).
        for k in range(topk):
            m_r = jnp.max(run_v, axis=1, keepdims=True)             # (TB, 1)
            m_t = jnp.max(work, axis=1, keepdims=True)              # (TB, 1)
            take_run = m_r >= m_t   # ties -> running entry (lower global index)
            v_k = jnp.maximum(m_r, m_t)

            # first (lowest-index) position achieving the max on each side
            p_r = jnp.min(jnp.where(run_v == m_r, k_col, jnp.int32(num_k)),
                          axis=1, keepdims=True)
            p_t = jnp.min(jnp.where(work == m_t, l_col, jnp.int32(seg_w)),
                          axis=1, keepdims=True)
            i_r = jnp.sum(jnp.where(k_col == p_r, run_i, 0),
                          axis=1, keepdims=True, dtype=jnp.int32)
            i_t = gbase + p_t
            i_k = jnp.where(take_run, i_r, i_t)

            # insert (v_k, i_k) into slot k of the new running list
            new_v = jnp.where(k_col == k, v_k, new_v)
            new_i = jnp.where(k_col == k, i_k, new_i)

            # consume the selected element from whichever side it came from
            run_v = jnp.where(take_run & (k_col == p_r), neg_inf, run_v)
            work = jnp.where(jnp.logical_not(take_run) & (l_col == p_t),
                             neg_inf, work)

        run_v, run_i = new_v, new_i

    vals_scr[...] = run_v
    idx_scr[...] = run_i

    @pl.when(s == num_s - 1)
    def _finalize():
        idx_out_ref[...] = idx_scr[...]


def _gather_kernel(idx_ref, q_row_ref, out_ref):
    """Grid gather: step i copies queue[idx[i], :] (already DMA'd by BlockSpec)."""
    del idx_ref  # only used by the index_maps
    out_ref[...] = q_row_ref[...]


def _tpu_vmem_capacity_bytes():
    try:
        return int(pltpu.get_tpu_info().vmem_capacity_bytes)
    except Exception:
        return 64 * 1024 * 1024  # conservative (v7x per-TensorCore VMEM)


def _has_two_tensorcores():
    try:
        kind = jax.devices()[0].device_kind.lower()
    except Exception:
        return False
    return ("v7" in kind) or ("v4" in kind)


def mugs_queue_forward(x, queue, topk, *, tile_s=None, tile_b=None,
                       use_bf16_matmul=False):
    """Eval-mode MugsQueue.forward: returns ((B, topk, D) neighbors, (B, topk) idx)."""
    assert x.ndim == 2 and queue.ndim == 2
    B, D = x.shape
    S, D2 = queue.shape
    assert D == D2 and S >= topk

    q_itemsize = jnp.dtype(queue.dtype).itemsize
    vmem_cap = _tpu_vmem_capacity_bytes()
    budget = int(0.45 * vmem_cap)  # working-set target used for tile picking

    if tile_b is None:
        tile_b = B
        # v4 / v7x have 2 TensorCores: give the "parallel" B axis extent >= 2.
        if _has_two_tensorcores() and B % 2 == 0 and (B // 2) % 8 == 0:
            tile_b = B // 2
    if tile_b % 8 != 0 and tile_b != B:
        tile_b = B
    assert B % tile_b == 0

    if tile_s is None:
        tile_s = S
        for cand in (2048, 1024, 512, 256, 128):
            if S % cand == 0 and 2 * cand * D * q_itemsize <= budget:
                tile_s = cand
                break
    assert S % tile_s == 0

    # VMEM plan: double-buffered x & queue blocks + idx out block + scratch +
    # the sim/merge working set; pass it explicitly so the compiler does not
    # fall back to the small default scoped limit.
    vmem_need = (2 * tile_b * D * 4                 # normalized-x block (f32), x2
                 + 2 * tile_s * D * q_itemsize      # queue block, x2
                 + 2 * tile_b * topk * 4            # idx out block, x2
                 + 2 * tile_b * topk * 4            # vals/idx scratch
                 + 4 * tile_b * tile_s * 4)         # sim + merge temporaries
    vmem_limit = int(min(0.9 * vmem_cap, max(32 * 1024 * 1024, 2 * vmem_need)))

    # Pre-normalize queries (tiny B*D op outside the kernel); this removes the
    # per-B-block normalization branch and a (tile_b, D) f32 VMEM scratch.
    xf = x.astype(jnp.float32)
    xn = xf * jax.lax.rsqrt(
        jnp.maximum(jnp.sum(xf * xf, axis=-1, keepdims=True), 1e-24))

    b_restreams = B // tile_b
    topk_idx = pl.pallas_call(
        functools.partial(_topk_sim_kernel, topk=topk,
                          use_bf16_matmul=use_bf16_matmul),
        out_shape=jax.ShapeDtypeStruct((B, topk), jnp.int32),
        grid_spec=pltpu.PrefetchScalarGridSpec(
            num_scalar_prefetch=0,
            grid=(B // tile_b, S // tile_s),
            in_specs=[
                pl.BlockSpec((tile_b, D), lambda b, s: (b, 0)),
                pl.BlockSpec((tile_s, D), lambda b, s: (s, 0)),
            ],
            out_specs=pl.BlockSpec((tile_b, topk), lambda b, s: (b, 0)),
            scratch_shapes=[
                pltpu.VMEM((tile_b, topk), jnp.float32),  # running top-k values
                pltpu.VMEM((tile_b, topk), jnp.int32),    # running top-k indices
            ],
        ),
        compiler_params=pltpu.CompilerParams(
            dimension_semantics=("parallel", "arbitrary"),
            vmem_limit_bytes=vmem_limit),
        cost_estimate=pl.CostEstimate(
            flops=2 * B * S * D,
            transcendentals=B + b_restreams * S,
            bytes_accessed=(b_restreams * S * D * q_itemsize
                            + B * D * 4 + B * topk * 4)),
    )(xn, queue)

    # Row gather of the raw queue, as a scalar-prefetch grid gather: indices land
    # in SMEM before the grid runs and drive the queue BlockSpec index_map, so
    # Pallas double-buffers the per-row HBM->VMEM DMAs and output writeback.
    n_rows = B * topk
    flat_idx = topk_idx.reshape(-1)
    neighbors_flat = pl.pallas_call(
        _gather_kernel,
        out_shape=jax.ShapeDtypeStruct((n_rows, D), queue.dtype),
        grid_spec=pltpu.PrefetchScalarGridSpec(
            num_scalar_prefetch=1,
            grid=(n_rows,),
            in_specs=[pl.BlockSpec((1, D), lambda i, idx_ref: (idx_ref[i], 0))],
            out_specs=pl.BlockSpec((1, D), lambda i, idx_ref: (i, 0)),
        ),
        compiler_params=pltpu.CompilerParams(
            dimension_semantics=("arbitrary",)),
    )(flat_idx, queue)

    neighbors = neighbors_flat.reshape(B, topk, D)  # pure reshape, no transpose
    return neighbors, topk_idx


def _reference(x, queue, topk):
    eps = 1e-12
    xn = x / jnp.maximum(jnp.linalg.norm(x, axis=-1, keepdims=True), eps)
    qn = queue / jnp.maximum(jnp.linalg.norm(queue, axis=-1, keepdims=True), eps)
    sim = jnp.einsum("bd,sd->bs", xn, qn, precision=jax.lax.Precision.HIGHEST)
    _, idx = jax.lax.top_k(sim, topk)
    neighbors = jnp.take(queue, idx.reshape(-1), axis=0)
    return neighbors.reshape(x.shape[0], topk, x.shape[1]), idx


if __name__ == "__main__":
    # Module hyper-parameters (small, synthetic): size=256, dim=32, topk=4
    SIZE, DIM, TOPK = 256, 32, 4
    BATCH = 8

    key = jax.random.PRNGKey(0)
    k_queue, k_x = jax.random.split(key)
    # deterministic "register_buffer('x', torch.randn(size, dim))" equivalent
    queue_buf = jax.random.normal(k_queue, (SIZE, DIM), dtype=jnp.float32)
    x_in = jax.random.normal(k_x, (BATCH, DIM), dtype=jnp.float32)

    ref_nbr, ref_idx = _reference(x_in, queue_buf, TOPK)

    # Config 1: default tiling (single queue tile, two 128-lane merge segments).
    nbr_a, idx_a = mugs_queue_forward(x_in, queue_buf, TOPK)
    nbr_a = jax.block_until_ready(nbr_a)
    idx_a = jax.block_until_ready(idx_a)
    assert nbr_a.shape == (BATCH, TOPK, DIM)
    assert jnp.array_equal(idx_a, ref_idx), "top-k index mismatch (default tiles)"
    assert jnp.allclose(nbr_a, ref_nbr, atol=1e-5, rtol=1e-5), "neighbor mismatch"

    # Config 2: tile_s=128 -> two queue tiles, exercising the streaming merge.
    nbr_b, idx_b = mugs_queue_forward(x_in, queue_buf, TOPK, tile_s=128)
    nbr_b = jax.block_until_ready(nbr_b)
    idx_b = jax.block_until_ready(idx_b)
    assert jnp.array_equal(idx_b, ref_idx), "top-k index mismatch (tile_s=128)"
    assert jnp.allclose(nbr_b, ref_nbr, atol=1e-5, rtol=1e-5), "neighbor mismatch"

    print("KERNEL_OK")
</pallas_src>

<mosaic_0001>
module attributes {stable_mosaic.version = 11 : i64} {
  func.func @_topk_sim_kernel(%arg0: i32, %arg1: i32, %arg2: memref<8x32xf32, #tpu.memory_space<vmem>>, %arg3: memref<256x32xf32, #tpu.memory_space<vmem>>, %arg4: memref<8x4xi32, #tpu.memory_space<vmem>>, %arg5: memref<8x4xf32, #tpu.memory_space<vmem>>, %arg6: memref<8x4xi32, #tpu.memory_space<vmem>>) attributes {dimension_semantics = [#tpu.dimension_semantics<parallel>, #tpu.dimension_semantics<arbitrary>], iteration_bounds = array<i64: 1, 1>, scalar_prefetch = 0 : i64, scratch_operands = 2 : i64, tpu.core_type = #tpu.core_type<tc>, window_params = [{transform_indices = @transform_0, window_bounds = array<i64: 8, 32>}, {transform_indices = @transform_1, window_bounds = array<i64: 256, 32>}, {transform_indices = @transform_2, window_bounds = array<i64: 8, 4>}]} {
    %c0_i32 = arith.constant 0 : i32
    %0 = arith.cmpi eq, %arg1, %c0_i32 : i32
    %1 = arith.extui %0 : i1 to i32
    %cst = arith.constant 0xFF800000 : f32
    %c0_i32_0 = arith.constant 0 : i32
    %2 = arith.cmpi ne, %1, %c0_i32_0 : i32
    scf.if %2 {
      %406 = vector.broadcast %cst : f32 to vector<8x4xf32>
      %c0_116 = arith.constant 0 : index
      %c0_117 = arith.constant 0 : index
      %407 = vector.load %arg5[%c0_116, %c0_117] : memref<8x4xf32, #tpu.memory_space<vmem>>, vector<8x4xf32>
      tpu.vector_store %arg5[%c0_116, %c0_117], %406 {strides = array<i32>} : memref<8x4xf32, #tpu.memory_space<vmem>>, vector<8x4xf32>,
      %c0_i32_118 = arith.constant 0 : i32
      %408 = vector.broadcast %c0_i32_118 : i32 to vector<8x4xi32>
      %c0_119 = arith.constant 0 : index
      %c0_120 = arith.constant 0 : index
      %409 = vector.load %arg6[%c0_119, %c0_120] : memref<8x4xi32, #tpu.memory_space<vmem>>, vector<8x4xi32>
      tpu.vector_store %arg6[%c0_119, %c0_120], %408 {strides = array<i32>} : memref<8x4xi32, #tpu.memory_space<vmem>>, vector<8x4xi32>,
    } else {
    }
    %c0 = arith.constant 0 : index
    %c0_1 = arith.constant 0 : index
    %3 = vector.load %arg3[%c0, %c0_1] : memref<256x32xf32, #tpu.memory_space<vmem>>, vector<256x32xf32>
    %4 = arith.mulf %3, %3 : vector<256x32xf32>
    %cst_2 = arith.constant dense<0.000000e+00> : vector<256xf32>
    %5 = vector.multi_reduction <add>, %4, %cst_2 [1] : vector<256x32xf32> to vector<256xf32>
    %6 = vector.shape_cast %5 : vector<256xf32> to vector<256x1xf32>
    %cst_3 = arith.constant 1.000000e-24 : f32
    %7 = vector.broadcast %cst_3 : f32 to vector<256x1xf32>
    %8 = arith.maximumf %6, %7 : vector<256x1xf32>
    %9 = math.rsqrt %8 : vector<256x1xf32>
    %10 = vector.broadcast %9 : vector<256x1xf32> to vector<256x32xf32>
    %11 = arith.mulf %3, %10 : vector<256x32xf32>
    %c0_4 = arith.constant 0 : index
    %c0_5 = arith.constant 0 : index
    %12 = vector.load %arg2[%c0_4, %c0_5] : memref<8x32xf32, #tpu.memory_space<vmem>>, vector<8x32xf32>
    %cst_6 = arith.constant dense<0.000000e+00> : vector<8x256xf32>
    %13 = tpu.matmul %12, %11, %cst_6 {dimension_numbers = #tpu.dot_dimension_numbers<[1], [1], [0], [0], [0, 0, 1, 0], [], []>} : vector<8x32xf32>, vector<256x32xf32>, vector<8x256xf32> -> vector<8x256xf32>
    %c256_i32 = arith.constant 256 : i32
    %14 = arith.muli %arg1, %c256_i32 : i32
    %c0_7 = arith.constant 0 : index
    %c0_8 = arith.constant 0 : index
    %15 = vector.load %arg5[%c0_7, %c0_8] : memref<8x4xf32, #tpu.memory_space<vmem>>, vector<8x4xf32>
    %c0_9 = arith.constant 0 : index
    %c0_10 = arith.constant 0 : index
    %16 = vector.load %arg6[%c0_9, %c0_10] : memref<8x4xi32, #tpu.memory_space<vmem>>, vector<8x4xi32>
    %17 = tpu.iota {dimensions = array<i32: 1>} : vector<8x4xi32>
    %18 = tpu.iota {dimensions = array<i32: 1>} : vector<8x128xi32>
    %19 = vector.extract_strided_slice %13 {offsets = [0, 0], sizes = [8, 128], strides = [1, 1]} : vector<8x256xf32> to vector<8x128xf32>
    %c0_i32_11 = arith.constant 0 : i32
    %20 = arith.addi %14, %c0_i32_11 : i32
    %cst_12 = arith.constant 0xFF800000 : f32
    %21 = vector.broadcast %cst_12 : f32 to vector<8x4xf32>
    %c0_i32_13 = arith.constant 0 : i32
    %22 = vector.broadcast %c0_i32_13 : i32 to vector<8x4xi32>
    %cst_14 = arith.constant dense<0xFF800000> : vector<8xf32>
    %23 = vector.multi_reduction <maximumf>, %15, %cst_14 [1] : vector<8x4xf32> to vector<8xf32>
    %24 = vector.shape_cast %23 : vector<8xf32> to vector<8x1xf32>
    %cst_15 = arith.constant dense<0xFF800000> : vector<8xf32>
    %25 = vector.multi_reduction <maximumf>, %19, %cst_15 [1] : vector<8x128xf32> to vector<8xf32>
    %26 = vector.shape_cast %25 : vector<8xf32> to vector<8x1xf32>
    %27 = arith.cmpf oge, %24, %26 : vector<8x1xf32>
    %28 = arith.maximumf %24, %26 : vector<8x1xf32>
    %29 = vector.broadcast %24 : vector<8x1xf32> to vector<8x4xf32>
    %30 = arith.cmpf oeq, %15, %29 : vector<8x4xf32>
    %c4_i32 = arith.constant 4 : i32
    %31 = vector.broadcast %c4_i32 : i32 to vector<8x4xi32>
    %32 = arith.select %30, %17, %31 : vector<8x4xi1>, vector<8x4xi32>
    %cst_16 = arith.constant dense<2147483647> : vector<8xi32>
    %33 = vector.multi_reduction <minsi>, %32, %cst_16 [1] : vector<8x4xi32> to vector<8xi32>
    %34 = vector.shape_cast %33 : vector<8xi32> to vector<8x1xi32>
    %35 = vector.broadcast %26 : vector<8x1xf32> to vector<8x128xf32>
    %36 = arith.cmpf oeq, %19, %35 : vector<8x128xf32>
    %c128_i32 = arith.constant 128 : i32
    %37 = vector.broadcast %c128_i32 : i32 to vector<8x128xi32>
    %38 = arith.select %36, %18, %37 : vector<8x128xi1>, vector<8x128xi32>
    %cst_17 = arith.constant dense<2147483647> : vector<8xi32>
    %39 = vector.multi_reduction <minsi>, %38, %cst_17 [1] : vector<8x128xi32> to vector<8xi32>
    %40 = vector.shape_cast %39 : vector<8xi32> to vector<8x1xi32>
    %41 = vector.broadcast %34 : vector<8x1xi32> to vector<8x4xi32>
    %42 = arith.cmpi eq, %17, %41 : vector<8x4xi32>
    %c0_i32_18 = arith.constant 0 : i32
    %43 = vector.broadcast %c0_i32_18 : i32 to vector<8x4xi32>
    %44 = arith.select %42, %16, %43 : vector<8x4xi1>, vector<8x4xi32>
    %cst_19 = arith.constant dense<0> : vector<8xi32>
    %45 = vector.multi_reduction <add>, %44, %cst_19 [1] : vector<8x4xi32> to vector<8xi32>
    %46 = vector.shape_cast %45 : vector<8xi32> to vector<8x1xi32>
    %47 = vector.broadcast %20 : i32 to vector<8x1xi32>
    %48 = arith.addi %47, %40 : vector<8x1xi32>
    %49 = arith.select %27, %46, %48 : vector<8x1xi1>, vector<8x1xi32>
    %c0_i32_20 = arith.constant 0 : i32
    %50 = vector.broadcast %c0_i32_20 : i32 to vector<8x4xi32>
    %51 = arith.cmpi eq, %17, %50 : vector<8x4xi32>
    %52 = vector.shape_cast %28 : vector<8x1xf32> to vector<8x1xf32>
    %53 = vector.broadcast %52 : vector<8x1xf32> to vector<8x4xf32>
    %54 = arith.select %51, %53, %21 : vector<8x4xi1>, vector<8x4xf32>
    %c0_i32_21 = arith.constant 0 : i32
    %55 = vector.broadcast %c0_i32_21 : i32 to vector<8x4xi32>
    %56 = arith.cmpi eq, %17, %55 : vector<8x4xi32>
    %57 = vector.shape_cast %49 : vector<8x1xi32> to vector<8x1xi32>
    %58 = vector.broadcast %57 : vector<8x1xi32> to vector<8x4xi32>
    %59 = arith.select %56, %58, %22 : vector<8x4xi1>, vector<8x4xi32>
    %60 = vector.broadcast %34 : vector<8x1xi32> to vector<8x4xi32>
    %61 = arith.cmpi eq, %17, %60 : vector<8x4xi32>
    %62 = vector.broadcast %27 : vector<8x1xi1> to vector<8x4xi1>
    %63 = arith.andi %62, %61 : vector<8x4xi1>
    %cst_22 = arith.constant 0xFF800000 : f32
    %64 = vector.broadcast %cst_22 : f32 to vector<8x4xf32>
    %65 = arith.select %63, %64, %15 : vector<8x4xi1>, vector<8x4xf32>
    %cst_23 = arith.constant dense<true> : vector<8x1xi1>
    %66 = arith.xori %27, %cst_23 : vector<8x1xi1>
    %67 = vector.broadcast %40 : vector<8x1xi32> to vector<8x128xi32>
    %68 = arith.cmpi eq, %18, %67 : vector<8x128xi32>
    %69 = vector.broadcast %66 : vector<8x1xi1> to vector<8x128xi1>
    %70 = arith.andi %69, %68 : vector<8x128xi1>
    %cst_24 = arith.constant 0xFF800000 : f32
    %71 = vector.broadcast %cst_24 : f32 to vector<8x128xf32>
    %72 = arith.select %70, %71, %19 : vector<8x128xi1>, vector<8x128xf32>
    %cst_25 = arith.constant dense<0xFF800000> : vector<8xf32>
    %73 = vector.multi_reduction <maximumf>, %65, %cst_25 [1] : vector<8x4xf32> to vector<8xf32>
    %74 = vector.shape_cast %73 : vector<8xf32> to vector<8x1xf32>
    %cst_26 = arith.constant dense<0xFF800000> : vector<8xf32>
    %75 = vector.multi_reduction <maximumf>, %72, %cst_26 [1] : vector<8x128xf32> to vector<8xf32>
    %76 = vector.shape_cast %75 : vector<8xf32> to vector<8x1xf32>
    %77 = arith.cmpf oge, %74, %76 : vector<8x1xf32>
    %78 = arith.maximumf %74, %76 : vector<8x1xf32>
    %79 = vector.broadcast %74 : vector<8x1xf32> to vector<8x4xf32>
    %80 = arith.cmpf oeq, %65, %79 : vector<8x4xf32>
    %c4_i32_27 = arith.constant 4 : i32
    %81 = vector.broadcast %c4_i32_27 : i32 to vector<8x4xi32>
    %82 = arith.select %80, %17, %81 : vector<8x4xi1>, vector<8x4xi32>
    %cst_28 = arith.constant dense<2147483647> : vector<8xi32>
    %83 = vector.multi_reduction <minsi>, %82, %cst_28 [1] : vector<8x4xi32> to vector<8xi32>
    %84 = vector.shape_cast %83 : vector<8xi32> to vector<8x1xi32>
    %85 = vector.broadcast %76 : vector<8x1xf32> to vector<8x128xf32>
    %86 = arith.cmpf oeq, %72, %85 : vector<8x128xf32>
    %c128_i32_29 = arith.constant 128 : i32
    %87 = vector.broadcast %c128_i32_29 : i32 to vector<8x128xi32>
    %88 = arith.select %86, %18, %87 : vector<8x128xi1>, vector<8x128xi32>
    %cst_30 = arith.constant dense<2147483647> : vector<8xi32>
    %89 = vector.multi_reduction <minsi>, %88, %cst_30 [1] : vector<8x128xi32> to vector<8xi32>
    %90 = vector.shape_cast %89 : vector<8xi32> to vector<8x1xi32>
    %91 = vector.broadcast %84 : vector<8x1xi32> to vector<8x4xi32>
    %92 = arith.cmpi eq, %17, %91 : vector<8x4xi32>
    %c0_i32_31 = arith.constant 0 : i32
    %93 = vector.broadcast %c0_i32_31 : i32 to vector<8x4xi32>
    %94 = arith.select %92, %16, %93 : vector<8x4xi1>, vector<8x4xi32>
    %cst_32 = arith.constant dense<0> : vector<8xi32>
    %95 = vector.multi_reduction <add>, %94, %cst_32 [1] : vector<8x4xi32> to vector<8xi32>
    %96 = vector.shape_cast %95 : vector<8xi32> to vector<8x1xi32>
    %97 = vector.broadcast %20 : i32 to vector<8x1xi32>
    %98 = arith.addi %97, %90 : vector<8x1xi32>
    %99 = arith.select %77, %96, %98 : vector<8x1xi1>, vector<8x1xi32>
    %c1_i32 = arith.constant 1 : i32
    %100 = vector.broadcast %c1_i32 : i32 to vector<8x4xi32>
    %101 = arith.cmpi eq, %17, %100 : vector<8x4xi32>
    %102 = vector.shape_cast %78 : vector<8x1xf32> to vector<8x1xf32>
    %103 = vector.broadcast %102 : vector<8x1xf32> to vector<8x4xf32>
    %104 = arith.select %101, %103, %54 : vector<8x4xi1>, vector<8x4xf32>
    %c1_i32_33 = arith.constant 1 : i32
    %105 = vector.broadcast %c1_i32_33 : i32 to vector<8x4xi32>
    %106 = arith.cmpi eq, %17, %105 : vector<8x4xi32>
    %107 = vector.shape_cast %99 : vector<8x1xi32> to vector<8x1xi32>
    %108 = vector.broadcast %107 : vector<8x1xi32> to vector<8x4xi32>
    %109 = arith.select %106, %108, %59 : vector<8x4xi1>, vector<8x4xi32>
    %110 = vector.broadcast %84 : vector<8x1xi32> to vector<8x4xi32>
    %111 = arith.cmpi eq, %17, %110 : vector<8x4xi32>
    %112 = vector.broadcast %77 : vector<8x1xi1> to vector<8x4xi1>
    %113 = arith.andi %112, %111 : vector<8x4xi1>
    %cst_34 = arith.constant 0xFF800000 : f32
    %114 = vector.broadcast %cst_34 : f32 to vector<8x4xf32>
    %115 = arith.select %113, %114, %65 : vector<8x4xi1>, vector<8x4xf32>
    %cst_35 = arith.constant dense<true> : vector<8x1xi1>
    %116 = arith.xori %77, %cst_35 : vector<8x1xi1>
    %117 = vector.broadcast %90 : vector<8x1xi32> to vector<8x128xi32>
    %118 = arith.cmpi eq, %18, %117 : vector<8x128xi32>
    %119 = vector.broadcast %116 : vector<8x1xi1> to vector<8x128xi1>
    %120 = arith.andi %119, %118 : vector<8x128xi1>
    %cst_36 = arith.constant 0xFF800000 : f32
    %121 = vector.broadcast %cst_36 : f32 to vector<8x128xf32>
    %122 = arith.select %120, %121, %72 : vector<8x128xi1>, vector<8x128xf32>
    %cst_37 = arith.constant dense<0xFF800000> : vector<8xf32>
    %123 = vector.multi_reduction <maximumf>, %115, %cst_37 [1] : vector<8x4xf32> to vector<8xf32>
    %124 = vector.shape_cast %123 : vector<8xf32> to vector<8x1xf32>
    %cst_38 = arith.constant dense<0xFF800000> : vector<8xf32>
    %125 = vector.multi_reduction <maximumf>, %122, %cst_38 [1] : vector<8x128xf32> to vector<8xf32>
    %126 = vector.shape_cast %125 : vector<8xf32> to vector<8x1xf32>
    %127 = arith.cmpf oge, %124, %126 : vector<8x1xf32>
    %128 = arith.maximumf %124, %126 : vector<8x1xf32>
    %129 = vector.broadcast %124 : vector<8x1xf32> to vector<8x4xf32>
    %130 = arith.cmpf oeq, %115, %129 : vector<8x4xf32>
    %c4_i32_39 = arith.constant 4 : i32
    %131 = vector.broadcast %c4_i32_39 : i32 to vector<8x4xi32>
    %132 = arith.select %130, %17, %131 : vector<8x4xi1>, vector<8x4xi32>
    %cst_40 = arith.constant dense<2147483647> : vector<8xi32>
    %133 = vector.multi_reduction <minsi>, %132, %cst_40 [1] : vector<8x4xi32> to vector<8xi32>
    %134 = vector.shape_cast %133 : vector<8xi32> to vector<8x1xi32>
    %135 = vector.broadcast %126 : vector<8x1xf32> to vector<8x128xf32>
    %136 = arith.cmpf oeq, %122, %135 : vector<8x128xf32>
    %c128_i32_41 = arith.constant 128 : i32
    %137 = vector.broadcast %c128_i32_41 : i32 to vector<8x128xi32>
    %138 = arith.select %136, %18, %137 : vector<8x128xi1>, vector<8x128xi32>
    %cst_42 = arith.constant dense<2147483647> : vector<8xi32>
    %139 = vector.multi_reduction <minsi>, %138, %cst_42 [1] : vector<8x128xi32> to vector<8xi32>
    %140 = vector.shape_cast %139 : vector<8xi32> to vector<8x1xi32>
    %141 = vector.broadcast %134 : vector<8x1xi32> to vector<8x4xi32>
    %142 = arith.cmpi eq, %17, %141 : vector<8x4xi32>
    %c0_i32_43 = arith.constant 0 : i32
    %143 = vector.broadcast %c0_i32_43 : i32 to vector<8x4xi32>
    %144 = arith.select %142, %16, %143 : vector<8x4xi1>, vector<8x4xi32>
    %cst_44 = arith.constant dense<0> : vector<8xi32>
    %145 = vector.multi_reduction <add>, %144, %cst_44 [1] : vector<8x4xi32> to vector<8xi32>
    %146 = vector.shape_cast %145 : vector<8xi32> to vector<8x1xi32>
    %147 = vector.broadcast %20 : i32 to vector<8x1xi32>
    %148 = arith.addi %147, %140 : vector<8x1xi32>
    %149 = arith.select %127, %146, %148 : vector<8x1xi1>, vector<8x1xi32>
    %c2_i32 = arith.constant 2 : i32
    %150 = vector.broadcast %c2_i32 : i32 to vector<8x4xi32>
    %151 = arith.cmpi eq, %17, %150 : vector<8x4xi32>
    %152 = vector.shape_cast %128 : vector<8x1xf32> to vector<8x1xf32>
    %153 = vector.broadcast %152 : vector<8x1xf32> to vector<8x4xf32>
    %154 = arith.select %151, %153, %104 : vector<8x4xi1>, vector<8x4xf32>
    %c2_i32_45 = arith.constant 2 : i32
    %155 = vector.broadcast %c2_i32_45 : i32 to vector<8x4xi32>
    %156 = arith.cmpi eq, %17, %155 : vector<8x4xi32>
    %157 = vector.shape_cast %149 : vector<8x1xi32> to vector<8x1xi32>
    %158 = vector.broadcast %157 : vector<8x1xi32> to vector<8x4xi32>
    %159 = arith.select %156, %158, %109 : vector<8x4xi1>, vector<8x4xi32>
    %160 = vector.broadcast %134 : vector<8x1xi32> to vector<8x4xi32>
    %161 = arith.cmpi eq, %17, %160 : vector<8x4xi32>
    %162 = vector.broadcast %127 : vector<8x1xi1> to vector<8x4xi1>
    %163 = arith.andi %162, %161 : vector<8x4xi1>
    %cst_46 = arith.constant 0xFF800000 : f32
    %164 = vector.broadcast %cst_46 : f32 to vector<8x4xf32>
    %165 = arith.select %163, %164, %115 : vector<8x4xi1>, vector<8x4xf32>
    %cst_47 = arith.constant dense<true> : vector<8x1xi1>
    %166 = arith.xori %127, %cst_47 : vector<8x1xi1>
    %167 = vector.broadcast %140 : vector<8x1xi32> to vector<8x128xi32>
    %168 = arith.cmpi eq, %18, %167 : vector<8x128xi32>
    %169 = vector.broadcast %166 : vector<8x1xi1> to vector<8x128xi1>
    %170 = arith.andi %169, %168 : vector<8x128xi1>
    %cst_48 = arith.constant 0xFF800000 : f32
    %171 = vector.broadcast %cst_48 : f32 to vector<8x128xf32>
    %172 = arith.select %170, %171, %122 : vector<8x128xi1>, vector<8x128xf32>
    %cst_49 = arith.constant dense<0xFF800000> : vector<8xf32>
    %173 = vector.multi_reduction <maximumf>, %165, %cst_49 [1] : vector<8x4xf32> to vector<8xf32>
    %174 = vector.shape_cast %173 : vector<8xf32> to vector<8x1xf32>
    %cst_50 = arith.constant dense<0xFF800000> : vector<8xf32>
    %175 = vector.multi_reduction <maximumf>, %172, %cst_50 [1] : vector<8x128xf32> to vector<8xf32>
    %176 = vector.shape_cast %175 : vector<8xf32> to vector<8x1xf32>
    %177 = arith.cmpf oge, %174, %176 : vector<8x1xf32>
    %178 = arith.maximumf %174, %176 : vector<8x1xf32>
    %179 = vector.broadcast %174 : vector<8x1xf32> to vector<8x4xf32>
    %180 = arith.cmpf oeq, %165, %179 : vector<8x4xf32>
    %c4_i32_51 = arith.constant 4 : i32
    %181 = vector.broadcast %c4_i32_51 : i32 to vector<8x4xi32>
    %182 = arith.select %180, %17, %181 : vector<8x4xi1>, vector<8x4xi32>
    %cst_52 = arith.constant dense<2147483647> : vector<8xi32>
    %183 = vector.multi_reduction <minsi>, %182, %cst_52 [1] : vector<8x4xi32> to vector<8xi32>
    %184 = vector.shape_cast %183 : vector<8xi32> to vector<8x1xi32>
    %185 = vector.broadcast %176 : vector<8x1xf32> to vector<8x128xf32>
    %186 = arith.cmpf oeq, %172, %185 : vector<8x128xf32>
    %c128_i32_53 = arith.constant 128 : i32
    %187 = vector.broadcast %c128_i32_53 : i32 to vector<8x128xi32>
    %188 = arith.select %186, %18, %187 : vector<8x128xi1>, vector<8x128xi32>
    %cst_54 = arith.constant dense<2147483647> : vector<8xi32>
    %189 = vector.multi_reduction <minsi>, %188, %cst_54 [1] : vector<8x128xi32> to vector<8xi32>
    %190 = vector.shape_cast %189 : vector<8xi32> to vector<8x1xi32>
    %191 = vector.broadcast %184 : vector<8x1xi32> to vector<8x4xi32>
    %192 = arith.cmpi eq, %17, %191 : vector<8x4xi32>
    %c0_i32_55 = arith.constant 0 : i32
    %193 = vector.broadcast %c0_i32_55 : i32 to vector<8x4xi32>
    %194 = arith.select %192, %16, %193 : vector<8x4xi1>, vector<8x4xi32>
    %cst_56 = arith.constant dense<0> : vector<8xi32>
    %195 = vector.multi_reduction <add>, %194, %cst_56 [1] : vector<8x4xi32> to vector<8xi32>
    %196 = vector.shape_cast %195 : vector<8xi32> to vector<8x1xi32>
    %197 = vector.broadcast %20 : i32 to vector<8x1xi32>
    %198 = arith.addi %197, %190 : vector<8x1xi32>
    %199 = arith.select %177, %196, %198 : vector<8x1xi1>, vector<8x1xi32>
    %c3_i32 = arith.constant 3 : i32
    %200 = vector.broadcast %c3_i32 : i32 to vector<8x4xi32>
    %201 = arith.cmpi eq, %17, %200 : vector<8x4xi32>
    %202 = vector.shape_cast %178 : vector<8x1xf32> to vector<8x1xf32>
    %203 = vector.broadcast %202 : vector<8x1xf32> to vector<8x4xf32>
    %204 = arith.select %201, %203, %154 : vector<8x4xi1>, vector<8x4xf32>
    %c3_i32_57 = arith.constant 3 : i32
    %205 = vector.broadcast %c3_i32_57 : i32 to vector<8x4xi32>
    %206 = arith.cmpi eq, %17, %205 : vector<8x4xi32>
    %207 = vector.shape_cast %199 : vector<8x1xi32> to vector<8x1xi32>
    %208 = vector.broadcast %207 : vector<8x1xi32> to vector<8x4xi32>
    %209 = arith.select %206, %208, %159 : vector<8x4xi1>, vector<8x4xi32>
    %210 = vector.extract_strided_slice %13 {offsets = [0, 128], sizes = [8, 128], strides = [1, 1]} : vector<8x256xf32> to vector<8x128xf32>
    %c128_i32_58 = arith.constant 128 : i32
    %211 = arith.addi %14, %c128_i32_58 : i32
    %cst_59 = arith.constant 0xFF800000 : f32
    %212 = vector.broadcast %cst_59 : f32 to vector<8x4xf32>
    %c0_i32_60 = arith.constant 0 : i32
    %213 = vector.broadcast %c0_i32_60 : i32 to vector<8x4xi32>
    %cst_61 = arith.constant dense<0xFF800000> : vector<8xf32>
    %214 = vector.multi_reduction <maximumf>, %204, %cst_61 [1] : vector<8x4xf32> to vector<8xf32>
    %215 = vector.shape_cast %214 : vector<8xf32> to vector<8x1xf32>
    %cst_62 = arith.constant dense<0xFF800000> : vector<8xf32>
    %216 = vector.multi_reduction <maximumf>, %210, %cst_62 [1] : vector<8x128xf32> to vector<8xf32>
    %217 = vector.shape_cast %216 : vector<8xf32> to vector<8x1xf32>
    %218 = arith.cmpf oge, %215, %217 : vector<8x1xf32>
    %219 = arith.maximumf %215, %217 : vector<8x1xf32>
    %220 = vector.broadcast %215 : vector<8x1xf32> to vector<8x4xf32>
    %221 = arith.cmpf oeq, %204, %220 : vector<8x4xf32>
    %c4_i32_63 = arith.constant 4 : i32
    %222 = vector.broadcast %c4_i32_63 : i32 to vector<8x4xi32>
    %223 = arith.select %221, %17, %222 : vector<8x4xi1>, vector<8x4xi32>
    %cst_64 = arith.constant dense<2147483647> : vector<8xi32>
    %224 = vector.multi_reduction <minsi>, %223, %cst_64 [1] : vector<8x4xi32> to vector<8xi32>
    %225 = vector.shape_cast %224 : vector<8xi32> to vector<8x1xi32>
    %226 = vector.broadcast %217 : vector<8x1xf32> to vector<8x128xf32>
    %227 = arith.cmpf oeq, %210, %226 : vector<8x128xf32>
    %c128_i32_65 = arith.constant 128 : i32
    %228 = vector.broadcast %c128_i32_65 : i32 to vector<8x128xi32>
    %229 = arith.select %227, %18, %228 : vector<8x128xi1>, vector<8x128xi32>
    %cst_66 = arith.constant dense<2147483647> : vector<8xi32>
    %230 = vector.multi_reduction <minsi>, %229, %cst_66 [1] : vector<8x128xi32> to vector<8xi32>
    %231 = vector.shape_cast %230 : vector<8xi32> to vector<8x1xi32>
    %232 = vector.broadcast %225 : vector<8x1xi32> to vector<8x4xi32>
    %233 = arith.cmpi eq, %17, %232 : vector<8x4xi32>
    %c0_i32_67 = arith.constant 0 : i32
    %234 = vector.broadcast %c0_i32_67 : i32 to vector<8x4xi32>
    %235 = arith.select %233, %209, %234 : vector<8x4xi1>, vector<8x4xi32>
    %cst_68 = arith.constant dense<0> : vector<8xi32>
    %236 = vector.multi_reduction <add>, %235, %cst_68 [1] : vector<8x4xi32> to vector<8xi32>
    %237 = vector.shape_cast %236 : vector<8xi32> to vector<8x1xi32>
    %238 = vector.broadcast %211 : i32 to vector<8x1xi32>
    %239 = arith.addi %238, %231 : vector<8x1xi32>
    %240 = arith.select %218, %237, %239 : vector<8x1xi1>, vector<8x1xi32>
    %c0_i32_69 = arith.constant 0 : i32
    %241 = vector.broadcast %c0_i32_69 : i32 to vector<8x4xi32>
    %242 = arith.cmpi eq, %17, %241 : vector<8x4xi32>
    %243 = vector.shape_cast %219 : vector<8x1xf32> to vector<8x1xf32>
    %244 = vector.broadcast %243 : vector<8x1xf32> to vector<8x4xf32>
    %245 = arith.select %242, %244, %212 : vector<8x4xi1>, vector<8x4xf32>
    %c0_i32_70 = arith.constant 0 : i32
    %246 = vector.broadcast %c0_i32_70 : i32 to vector<8x4xi32>
    %247 = arith.cmpi eq, %17, %246 : vector<8x4xi32>
    %248 = vector.shape_cast %240 : vector<8x1xi32> to vector<8x1xi32>
    %249 = vector.broadcast %248 : vector<8x1xi32> to vector<8x4xi32>
    %250 = arith.select %247, %249, %213 : vector<8x4xi1>, vector<8x4xi32>
    %251 = vector.broadcast %225 : vector<8x1xi32> to vector<8x4xi32>
    %252 = arith.cmpi eq, %17, %251 : vector<8x4xi32>
    %253 = vector.broadcast %218 : vector<8x1xi1> to vector<8x4xi1>
    %254 = arith.andi %253, %252 : vector<8x4xi1>
    %cst_71 = arith.constant 0xFF800000 : f32
    %255 = vector.broadcast %cst_71 : f32 to vector<8x4xf32>
    %256 = arith.select %254, %255, %204 : vector<8x4xi1>, vector<8x4xf32>
    %cst_72 = arith.constant dense<true> : vector<8x1xi1>
    %257 = arith.xori %218, %cst_72 : vector<8x1xi1>
    %258 = vector.broadcast %231 : vector<8x1xi32> to vector<8x128xi32>
    %259 = arith.cmpi eq, %18, %258 : vector<8x128xi32>
    %260 = vector.broadcast %257 : vector<8x1xi1> to vector<8x128xi1>
    %261 = arith.andi %260, %259 : vector<8x128xi1>
    %cst_73 = arith.constant 0xFF800000 : f32
    %262 = vector.broadcast %cst_73 : f32 to vector<8x128xf32>
    %263 = arith.select %261, %262, %210 : vector<8x128xi1>, vector<8x128xf32>
    %cst_74 = arith.constant dense<0xFF800000> : vector<8xf32>
    %264 = vector.multi_reduction <maximumf>, %256, %cst_74 [1] : vector<8x4xf32> to vector<8xf32>
    %265 = vector.shape_cast %264 : vector<8xf32> to vector<8x1xf32>
    %cst_75 = arith.constant dense<0xFF800000> : vector<8xf32>
    %266 = vector.multi_reduction <maximumf>, %263, %cst_75 [1] : vector<8x128xf32> to vector<8xf32>
    %267 = vector.shape_cast %266 : vector<8xf32> to vector<8x1xf32>
    %268 = arith.cmpf oge, %265, %267 : vector<8x1xf32>
    %269 = arith.maximumf %265, %267 : vector<8x1xf32>
    %270 = vector.broadcast %265 : vector<8x1xf32> to vector<8x4xf32>
    %271 = arith.cmpf oeq, %256, %270 : vector<8x4xf32>
    %c4_i32_76 = arith.constant 4 : i32
    %272 = vector.broadcast %c4_i32_76 : i32 to vector<8x4xi32>
    %273 = arith.select %271, %17, %272 : vector<8x4xi1>, vector<8x4xi32>
    %cst_77 = arith.constant dense<2147483647> : vector<8xi32>
    %274 = vector.multi_reduction <minsi>, %273, %cst_77 [1] : vector<8x4xi32> to vector<8xi32>
    %275 = vector.shape_cast %274 : vector<8xi32> to vector<8x1xi32>
    %276 = vector.broadcast %267 : vector<8x1xf32> to vector<8x128xf32>
    %277 = arith.cmpf oeq, %263, %276 : vector<8x128xf32>
    %c128_i32_78 = arith.constant 128 : i32
    %278 = vector.broadcast %c128_i32_78 : i32 to vector<8x128xi32>
    %279 = arith.select %277, %18, %278 : vector<8x128xi1>, vector<8x128xi32>
    %cst_79 = arith.constant dense<2147483647> : vector<8xi32>
    %280 = vector.multi_reduction <minsi>, %279, %cst_79 [1] : vector<8x128xi32> to vector<8xi32>
    %281 = vector.shape_cast %280 : vector<8xi32> to vector<8x1xi32>
    %282 = vector.broadcast %275 : vector<8x1xi32> to vector<8x4xi32>
    %283 = arith.cmpi eq, %17, %282 : vector<8x4xi32>
    %c0_i32_80 = arith.constant 0 : i32
    %284 = vector.broadcast %c0_i32_80 : i32 to vector<8x4xi32>
    %285 = arith.select %283, %209, %284 : vector<8x4xi1>, vector<8x4xi32>
    %cst_81 = arith.constant dense<0> : vector<8xi32>
    %286 = vector.multi_reduction <add>, %285, %cst_81 [1] : vector<8x4xi32> to vector<8xi32>
    %287 = vector.shape_cast %286 : vector<8xi32> to vector<8x1xi32>
    %288 = vector.broadcast %211 : i32 to vector<8x1xi32>
    %289 = arith.addi %288, %281 : vector<8x1xi32>
    %290 = arith.select %268, %287, %289 : vector<8x1xi1>, vector<8x1xi32>
    %c1_i32_82 = arith.constant 1 : i32
    %291 = vector.broadcast %c1_i32_82 : i32 to vector<8x4xi32>
    %292 = arith.cmpi eq, %17, %291 : vector<8x4xi32>
    %293 = vector.shape_cast %269 : vector<8x1xf32> to vector<8x1xf32>
    %294 = vector.broadcast %293 : vector<8x1xf32> to vector<8x4xf32>
    %295 = arith.select %292, %294, %245 : vector<8x4xi1>, vector<8x4xf32>
    %c1_i32_83 = arith.constant 1 : i32
    %296 = vector.broadcast %c1_i32_83 : i32 to vector<8x4xi32>
    %297 = arith.cmpi eq, %17, %296 : vector<8x4xi32>
    %298 = vector.shape_cast %290 : vector<8x1xi32> to vector<8x1xi32>
    %299 = vector.broadcast %298 : vector<8x1xi32> to vector<8x4xi32>
    %300 = arith.select %297, %299, %250 : vector<8x4xi1>, vector<8x4xi32>
    %301 = vector.broadcast %275 : vector<8x1xi32> to vector<8x4xi32>
    %302 = arith.cmpi eq, %17, %301 : vector<8x4xi32>
    %303 = vector.broadcast %268 : vector<8x1xi1> to vector<8x4xi1>
    %304 = arith.andi %303, %302 : vector<8x4xi1>
    %cst_84 = arith.constant 0xFF800000 : f32
    %305 = vector.broadcast %cst_84 : f32 to vector<8x4xf32>
    %306 = arith.select %304, %305, %256 : vector<8x4xi1>, vector<8x4xf32>
    %cst_85 = arith.constant dense<true> : vector<8x1xi1>
    %307 = arith.xori %268, %cst_85 : vector<8x1xi1>
    %308 = vector.broadcast %281 : vector<8x1xi32> to vector<8x128xi32>
    %309 = arith.cmpi eq, %18, %308 : vector<8x128xi32>
    %310 = vector.broadcast %307 : vector<8x1xi1> to vector<8x128xi1>
    %311 = arith.andi %310, %309 : vector<8x128xi1>
    %cst_86 = arith.constant 0xFF800000 : f32
    %312 = vector.broadcast %cst_86 : f32 to vector<8x128xf32>
    %313 = arith.select %311, %312, %263 : vector<8x128xi1>, vector<8x128xf32>
    %cst_87 = arith.constant dense<0xFF800000> : vector<8xf32>
    %314 = vector.multi_reduction <maximumf>, %306, %cst_87 [1] : vector<8x4xf32> to vector<8xf32>
    %315 = vector.shape_cast %314 : vector<8xf32> to vector<8x1xf32>
    %cst_88 = arith.constant dense<0xFF800000> : vector<8xf32>
    %316 = vector.multi_reduction <maximumf>, %313, %cst_88 [1] : vector<8x128xf32> to vector<8xf32>
    %317 = vector.shape_cast %316 : vector<8xf32> to vector<8x1xf32>
    %318 = arith.cmpf oge, %315, %317 : vector<8x1xf32>
    %319 = arith.maximumf %315, %317 : vector<8x1xf32>
    %320 = vector.broadcast %315 : vector<8x1xf32> to vector<8x4xf32>
    %321 = arith.cmpf oeq, %306, %320 : vector<8x4xf32>
    %c4_i32_89 = arith.constant 4 : i32
    %322 = vector.broadcast %c4_i32_89 : i32 to vector<8x4xi32>
    %323 = arith.select %321, %17, %322 : vector<8x4xi1>, vector<8x4xi32>
    %cst_90 = arith.constant dense<2147483647> : vector<8xi32>
    %324 = vector.multi_reduction <minsi>, %323, %cst_90 [1] : vector<8x4xi32> to vector<8xi32>
    %325 = vector.shape_cast %324 : vector<8xi32> to vector<8x1xi32>
    %326 = vector.broadcast %317 : vector<8x1xf32> to vector<8x128xf32>
    %327 = arith.cmpf oeq, %313, %326 : vector<8x128xf32>
    %c128_i32_91 = arith.constant 128 : i32
    %328 = vector.broadcast %c128_i32_91 : i32 to vector<8x128xi32>
    %329 = arith.select %327, %18, %328 : vector<8x128xi1>, vector<8x128xi32>
    %cst_92 = arith.constant dense<2147483647> : vector<8xi32>
    %330 = vector.multi_reduction <minsi>, %329, %cst_92 [1] : vector<8x128xi32> to vector<8xi32>
    %331 = vector.shape_cast %330 : vector<8xi32> to vector<8x1xi32>
    %332 = vector.broadcast %325 : vector<8x1xi32> to vector<8x4xi32>
    %333 = arith.cmpi eq, %17, %332 : vector<8x4xi32>
    %c0_i32_93 = arith.constant 0 : i32
    %334 = vector.broadcast %c0_i32_93 : i32 to vector<8x4xi32>
    %335 = arith.select %333, %209, %334 : vector<8x4xi1>, vector<8x4xi32>
    %cst_94 = arith.constant dense<0> : vector<8xi32>
    %336 = vector.multi_reduction <add>, %335, %cst_94 [1] : vector<8x4xi32> to vector<8xi32>
    %337 = vector.shape_cast %336 : vector<8xi32> to vector<8x1xi32>
    %338 = vector.broadcast %211 : i32 to vector<8x1xi32>
    %339 = arith.addi %338, %331 : vector<8x1xi32>
    %340 = arith.select %318, %337, %339 : vector<8x1xi1>, vector<8x1xi32>
    %c2_i32_95 = arith.constant 2 : i32
    %341 = vector.broadcast %c2_i32_95 : i32 to vector<8x4xi32>
    %342 = arith.cmpi eq, %17, %341 : vector<8x4xi32>
    %343 = vector.shape_cast %319 : vector<8x1xf32> to vector<8x1xf32>
    %344 = vector.broadcast %343 : vector<8x1xf32> to vector<8x4xf32>
    %345 = arith.select %342, %344, %295 : vector<8x4xi1>, vector<8x4xf32>
    %c2_i32_96 = arith.constant 2 : i32
    %346 = vector.broadcast %c2_i32_96 : i32 to vector<8x4xi32>
    %347 = arith.cmpi eq, %17, %346 : vector<8x4xi32>
    %348 = vector.shape_cast %340 : vector<8x1xi32> to vector<8x1xi32>
    %349 = vector.broadcast %348 : vector<8x1xi32> to vector<8x4xi32>
    %350 = arith.select %347, %349, %300 : vector<8x4xi1>, vector<8x4xi32>
    %351 = vector.broadcast %325 : vector<8x1xi32> to vector<8x4xi32>
    %352 = arith.cmpi eq, %17, %351 : vector<8x4xi32>
    %353 = vector.broadcast %318 : vector<8x1xi1> to vector<8x4xi1>
    %354 = arith.andi %353, %352 : vector<8x4xi1>
    %cst_97 = arith.constant 0xFF800000 : f32
    %355 = vector.broadcast %cst_97 : f32 to vector<8x4xf32>
    %356 = arith.select %354, %355, %306 : vector<8x4xi1>, vector<8x4xf32>
    %cst_98 = arith.constant dense<true> : vector<8x1xi1>
    %357 = arith.xori %318, %cst_98 : vector<8x1xi1>
    %358 = vector.broadcast %331 : vector<8x1xi32> to vector<8x128xi32>
    %359 = arith.cmpi eq, %18, %358 : vector<8x128xi32>
    %360 = vector.broadcast %357 : vector<8x1xi1> to vector<8x128xi1>
    %361 = arith.andi %360, %359 : vector<8x128xi1>
    %cst_99 = arith.constant 0xFF800000 : f32
    %362 = vector.broadcast %cst_99 : f32 to vector<8x128xf32>
    %363 = arith.select %361, %362, %313 : vector<8x128xi1>, vector<8x128xf32>
    %cst_100 = arith.constant dense<0xFF800000> : vector<8xf32>
    %364 = vector.multi_reduction <maximumf>, %356, %cst_100 [1] : vector<8x4xf32> to vector<8xf32>
    %365 = vector.shape_cast %364 : vector<8xf32> to vector<8x1xf32>
    %cst_101 = arith.constant dense<0xFF800000> : vector<8xf32>
    %366 = vector.multi_reduction <maximumf>, %363, %cst_101 [1] : vector<8x128xf32> to vector<8xf32>
    %367 = vector.shape_cast %366 : vector<8xf32> to vector<8x1xf32>
    %368 = arith.cmpf oge, %365, %367 : vector<8x1xf32>
    %369 = arith.maximumf %365, %367 : vector<8x1xf32>
    %370 = vector.broadcast %365 : vector<8x1xf32> to vector<8x4xf32>
    %371 = arith.cmpf oeq, %356, %370 : vector<8x4xf32>
    %c4_i32_102 = arith.constant 4 : i32
    %372 = vector.broadcast %c4_i32_102 : i32 to vector<8x4xi32>
    %373 = arith.select %371, %17, %372 : vector<8x4xi1>, vector<8x4xi32>
    %cst_103 = arith.constant dense<2147483647> : vector<8xi32>
    %374 = vector.multi_reduction <minsi>, %373, %cst_103 [1] : vector<8x4xi32> to vector<8xi32>
    %375 = vector.shape_cast %374 : vector<8xi32> to vector<8x1xi32>
    %376 = vector.broadcast %367 : vector<8x1xf32> to vector<8x128xf32>
    %377 = arith.cmpf oeq, %363, %376 : vector<8x128xf32>
    %c128_i32_104 = arith.constant 128 : i32
    %378 = vector.broadcast %c128_i32_104 : i32 to vector<8x128xi32>
    %379 = arith.select %377, %18, %378 : vector<8x128xi1>, vector<8x128xi32>
    %cst_105 = arith.constant dense<2147483647> : vector<8xi32>
    %380 = vector.multi_reduction <minsi>, %379, %cst_105 [1] : vector<8x128xi32> to vector<8xi32>
    %381 = vector.shape_cast %380 : vector<8xi32> to vector<8x1xi32>
    %382 = vector.broadcast %375 : vector<8x1xi32> to vector<8x4xi32>
    %383 = arith.cmpi eq, %17, %382 : vector<8x4xi32>
    %c0_i32_106 = arith.constant 0 : i32
    %384 = vector.broadcast %c0_i32_106 : i32 to vector<8x4xi32>
    %385 = arith.select %383, %209, %384 : vector<8x4xi1>, vector<8x4xi32>
    %cst_107 = arith.constant dense<0> : vector<8xi32>
    %386 = vector.multi_reduction <add>, %385, %cst_107 [1] : vector<8x4xi32> to vector<8xi32>
    %387 = vector.shape_cast %386 : vector<8xi32> to vector<8x1xi32>
    %388 = vector.broadcast %211 : i32 to vector<8x1xi32>
    %389 = arith.addi %388, %381 : vector<8x1xi32>
    %390 = arith.select %368, %387, %389 : vector<8x1xi1>, vector<8x1xi32>
    %c3_i32_108 = arith.constant 3 : i32
    %391 = vector.broadcast %c3_i32_108 : i32 to vector<8x4xi32>
    %392 = arith.cmpi eq, %17, %391 : vector<8x4xi32>
    %393 = vector.shape_cast %369 : vector<8x1xf32> to vector<8x1xf32>
    %394 = vector.broadcast %393 : vector<8x1xf32> to vector<8x4xf32>
    %395 = arith.select %392, %394, %345 : vector<8x4xi1>, vector<8x4xf32>
    %c3_i32_109 = arith.constant 3 : i32
    %396 = vector.broadcast %c3_i32_109 : i32 to vector<8x4xi32>
    %397 = arith.cmpi eq, %17, %396 : vector<8x4xi32>
    %398 = vector.shape_cast %390 : vector<8x1xi32> to vector<8x1xi32>
    %399 = vector.broadcast %398 : vector<8x1xi32> to vector<8x4xi32>
    %400 = arith.select %397, %399, %350 : vector<8x4xi1>, vector<8x4xi32>
    %c0_110 = arith.constant 0 : index
    %c0_111 = arith.constant 0 : index
    %401 = vector.load %arg5[%c0_110, %c0_111] : memref<8x4xf32, #tpu.memory_space<vmem>>, vector<8x4xf32>
    tpu.vector_store %arg5[%c0_110, %c0_111], %395 {strides = array<i32>} : memref<8x4xf32, #tpu.memory_space<vmem>>, vector<8x4xf32>,
    %c0_112 = arith.constant 0 : index
    %c0_113 = arith.constant 0 : index
    %402 = vector.load %arg6[%c0_112, %c0_113] : memref<8x4xi32, #tpu.memory_space<vmem>>, vector<8x4xi32>
    tpu.vector_store %arg6[%c0_112, %c0_113], %400 {strides = array<i32>} : memref<8x4xi32, #tpu.memory_space<vmem>>, vector<8x4xi32>,
    %c0_i32_114 = arith.constant 0 : i32
    %403 = arith.cmpi eq, %arg1, %c0_i32_114 : i32
    %404 = arith.extui %403 : i1 to i32
    %c0_i32_115 = arith.constant 0 : i32
    %405 = arith.cmpi ne, %404, %c0_i32_115 : i32
    scf.if %405 {
      %c0_116 = arith.constant 0 : index
      %c0_117 = arith.constant 0 : index
      %406 = vector.load %arg6[%c0_116, %c0_117] : memref<8x4xi32, #tpu.memory_space<vmem>>, vector<8x4xi32>
      %c0_118 = arith.constant 0 : index
      %c0_119 = arith.constant 0 : index
      %407 = vector.load %arg4[%c0_118, %c0_119] : memref<8x4xi32, #tpu.memory_space<vmem>>, vector<8x4xi32>
      tpu.vector_store %arg4[%c0_118, %c0_119], %406 {strides = array<i32>} : memref<8x4xi32, #tpu.memory_space<vmem>>, vector<8x4xi32>,
    } else {
    }
    return
  }
  func.func @transform_0(%arg0: i32, %arg1: i32) -> (i32, i32) {
    %c0_i32 = arith.constant 0 : i32
    %c0_i32_0 = arith.constant 0 : i32
    return %arg0, %c0_i32 : i32, i32
  }
  func.func @transform_1(%arg0: i32, %arg1: i32) -> (i32, i32) {
    %c0_i32 = arith.constant 0 : i32
    %c0_i32_0 = arith.constant 0 : i32
    return %arg1, %c0_i32 : i32, i32
  }
  func.func @transform_2(%arg0: i32, %arg1: i32) -> (i32, i32) {
    %c0_i32 = arith.constant 0 : i32
    %c0_i32_0 = arith.constant 0 : i32
    return %arg0, %c0_i32 : i32, i32
  }
}

</mosaic_0001>

<bundles_post_ra>
// kernel: tpu_custom_call.1
= control target key start
LH: loop header
LB: loop body
LE: loop exit
PB: predicated region body
PF: predicated region fallthrough
CT: control target
= control target key end

     0   :  { %vm15_vm0 = vcmask 31744   ;;  %vm82_vm1 = vcmask 261120   ;;  %v1136_v3 = vmov -inf   ;;  %vm1138_vm11 = vmmov 1   ;;  %s1846_s1 = inlined_call_operand.vmem [shape: f32[256,32], index: 1, kind: input, shape index: {}]   ;;  %s1847_s0 = inlined_call_operand.vmem [shape: f32[8,32], index: 0, kind: input, shape index: {}]   ;;  %s1848_s2 = inlined_call_operand.vmem [shape: s32[8,4], index: 2, kind: output, shape index: {}]  }
   0x1   :  { %v1157_v0 = vld [vmem:[%s1846_s1 + $0xf8] sm:$0xff]  ;;  %v1162_v1 = vld [vmem:[%s1846_s1 + $0xf0] sm:$0xff]  ;;  %16 = vst.msk [vmem:[#allocation2] sm:$0xff] %vm15_vm0, %v1136_v3  ;;  %v1186_v9 = vld [vmem:[%s1846_s1 + $0xe8] sm:$0xff] }
   0x2   :  { %v1167_v2 = vld [vmem:[%s1846_s1 + $0x78] sm:$0xff]  ;;  %v81_v4 = vmul.f32 %v1157_v0, %v1157_v0  ;;  %v80_v5 = vmul.f32 %v1162_v1, %v1162_v1  ;;  %v1179_v7 = vld [vmem:[%s1846_s1 + $0x70] sm:$0xff]  ;;  %v1191_v10 = vld [vmem:[%s1846_s1 + $0x68] sm:$0xff]  ;;  %v79_v15 = vmul.f32 %v1186_v9, %v1186_v9 }
   0x3   :  { %v65_v6 = vmul.f32 %v1167_v2, %v1167_v2  ;;  %v64_v8 = vmul.f32 %v1179_v7, %v1179_v7  ;;  %v63_v16 = vmul.f32 %v1191_v10, %v1191_v10  ;;  %v1204_v17 = vld [vmem:[%s1846_s1 + $0xe0] sm:$0xff]  ;;  %v1220_v23 = vld [vmem:[%s1846_s1 + $0xd8] sm:$0xff]  ;;  %v1236_v29 = vld [vmem:[%s1846_s1 + $0xd0] sm:$0xff] }
   0x4   :  { %v176_v11 = vsel %vm82_vm1, %v81_v4, 0.0  ;;  %v173_v12 = vsel %vm82_vm1, %v80_v5, 0.0  ;;  %v1209_v18 = vld [vmem:[%s1846_s1 + $0x60] sm:$0xff]  ;;  %v170_v19 = vsel %vm82_vm1, %v79_v15, 0.0  ;;  %v78_v21 = vmul.f32 %v1204_v17, %v1204_v17  ;;  %v1225_v24 = vld [vmem:[%s1846_s1 + $0x58] sm:$0xff]  ;;  %v1241_v30 = vld [vmem:[%s1846_s1 + $0x50] sm:$0xff] }
   0x5   :  { %177 = vadd.xlane.f32.xlu0 %v176_v11  ;;  %174 = vadd.xlane.f32.xlu1 %v173_v12  ;;  %v128_v13 = vsel %vm82_vm1, %v65_v6, 0.0  ;;  %v125_v14 = vsel %vm82_vm1, %v64_v8, 0.0  ;;  %v122_v20 = vsel %vm82_vm1, %v63_v16, 0.0  ;;  %v62_v22 = vmul.f32 %v1209_v18, %v1209_v18  ;;  %v1252_v35 = vld [vmem:[%s1846_s1 + $0xc8] sm:$0xff]  ;;  %v1268_v41 = vld [vmem:[%s1846_s1 + $0xc0] sm:$0xff]  ;;  %v1284_v47 = vld [vmem:[%s1846_s1 + $0xb8] sm:$0xff] }
   0x6   :  { %v167_v25 = vsel %vm82_vm1, %v78_v21, 0.0  ;;  %v77_v27 = vmul.f32 %v1220_v23, %v1220_v23  ;;  %v61_v28 = vmul.f32 %v1225_v24, %v1225_v24  ;;  %v76_v33 = vmul.f32 %v1236_v29, %v1236_v29  ;;  %v1257_v36 = vld [vmem:[%s1846_s1 + $0x48] sm:$0xff]  ;;  %v1273_v42 = vld [vmem:[%s1846_s1 + $0x40] sm:$0xff]  ;;  %v1289_v48 = vld [vmem:[%s1846_s1 + $0x38] sm:$0xff] }
   0x7   :  { %v119_v26 = vsel %vm82_vm1, %v62_v22, 0.0  ;;  %v60_v34 = vmul.f32 %v1241_v30, %v1241_v30  ;;  %v75_v39 = vmul.f32 %v1252_v35, %v1252_v35  ;;  %v59_v40 = vmul.f32 %v1257_v36, %v1257_v36  ;;  %v1300_v53 = vld [vmem:[%s1846_s1 + $0xb0] sm:$0xff]  ;;  %v1316_v59 = vld [vmem:[%s1846_s1 + $0xa8] sm:$0xff]  ;;  %v1332_v4 = vld [vmem:[%s1846_s1 + $0xa0] sm:$0xff] }
   0x8   :  { %v164_v31 = vsel %vm82_vm1, %v77_v27, 0.0  ;;  %v116_v32 = vsel %vm82_vm1, %v61_v28, 0.0  ;;  %v161_v37 = vsel %vm82_vm1, %v76_v33, 0.0  ;;  %v74_v45 = vmul.f32 %v1268_v41, %v1268_v41  ;;  %v1305_v54 = vld [vmem:[%s1846_s1 + $0x30] sm:$0xff]  ;;  %v1321_v60 = vld [vmem:[%s1846_s1 + $0x28] sm:$0xff]  ;;  %v1337_v5 = vld [vmem:[%s1846_s1 + $0x20] sm:$0xff] }
   0x9   :  { %129 = vadd.xlane.f32.xlu0 %v128_v13  ;;  %126 = vadd.xlane.f32.xlu1 %v125_v14  ;;  %v113_v38 = vsel %vm82_vm1, %v60_v34, 0.0  ;;  %v158_v43 = vsel %vm82_vm1, %v75_v39, 0.0  ;;  %v110_v44 = vsel %vm82_vm1, %v59_v40, 0.0  ;;  %v58_v46 = vmul.f32 %v1273_v42, %v1273_v42  ;;  %v1348_v13 = vld [vmem:[%s1846_s1 + $0x98] sm:$0xff]  ;;  %v1364_v21 = vld [vmem:[%s1846_s1 + $0x90] sm:$0xff]  ;;  %v1396_v39 = vld [vmem:[%s1846_s1 + $0x80] sm:$0xff] }
   0xa   :  { %v155_v49 = vsel %vm82_vm1, %v74_v45, 0.0  ;;  %v73_v51 = vmul.f32 %v1284_v47, %v1284_v47  ;;  %v57_v52 = vmul.f32 %v1289_v48, %v1289_v48  ;;  %v72_v57 = vmul.f32 %v1300_v53, %v1300_v53  ;;  %v1353_v14 = vld [vmem:[%s1846_s1 + $0x18] sm:$0xff]  ;;  %v1369_v22 = vld [vmem:[%s1846_s1 + $0x10] sm:$0xff]  ;;  %v1401_v40 = vld [vmem:[%s1846_s1] sm:$0xff] }
   0xb   :  { %v107_v50 = vsel %vm82_vm1, %v58_v46, 0.0  ;;  %v56_v58 = vmul.f32 %v1305_v54, %v1305_v54  ;;  %v71_v63 = vmul.f32 %v1316_v59, %v1316_v59  ;;  %v55_v3 = vmul.f32 %v1321_v60, %v1321_v60 }
   0xc   :  { %v152_v55 = vsel %vm82_vm1, %v73_v51, 0.0  ;;  %v104_v56 = vsel %vm82_vm1, %v57_v52, 0.0  ;;  %v149_v61 = vsel %vm82_vm1, %v72_v57, 0.0  ;;  %v70_v11 = vmul.f32 %v1332_v4, %v1332_v4  ;;  %v1411_v51 = vld [vmem:[#allocation2] sm:$0xff] }
   0xd   :  { %171 = vadd.xlane.f32.xlu0 %v170_v19  ;;  %123 = vadd.xlane.f32.xlu1 %v122_v20  ;;  %v101_v62 = vsel %vm82_vm1, %v56_v58, 0.0  ;;  %v146_v6 = vsel %vm82_vm1, %v71_v63, 0.0  ;;  %v98_v8 = vsel %vm82_vm1, %v55_v3, 0.0  ;;  %v54_v12 = vmul.f32 %v1337_v5, %v1337_v5 }
   0xe   :  { %v143_v15 = vsel %vm82_vm1, %v70_v11, 0.0  ;;  %v69_v19 = vmul.f32 %v1348_v13, %v1348_v13  ;;  %v53_v20 = vmul.f32 %v1353_v14, %v1353_v14  ;;  %v68_v27 = vmul.f32 %v1364_v21, %v1364_v21 }
   0xf   :  { %v95_v16 = vsel %vm82_vm1, %v54_v12, 0.0  ;;  %v52_v28 = vmul.f32 %v1369_v22, %v1369_v22  ;;  %v66_v45 = vmul.f32 %v1396_v39, %v1396_v39  ;;  %v50_v46 = vmul.f32 %v1401_v40, %v1401_v40 }
  0x10   :  { %v137_v33 = vsel %vm82_vm1, %v68_v27, 0.0  ;;  %v452_v52 = vsel %vm15_vm0, %v1411_v51, -inf }
  0x11   :  { %168 = vadd.xlane.f32.xlu0 %v167_v25  ;;  %120 = vadd.xlane.f32.xlu1 %v119_v26  ;;  %v140_v25 = vsel %vm82_vm1, %v69_v19, 0.0  ;;  %v92_v26 = vsel %vm82_vm1, %v53_v20, 0.0  ;;  %v89_v34 = vsel %vm82_vm1, %v52_v28, 0.0 }
  0x15   :  { %165 = vadd.xlane.f32.xlu0 %v164_v31  ;;  %117 = vadd.xlane.f32.xlu1 %v116_v32  ;;  %v1380_v31 = vld [vmem:[%s1846_s1 + $0x88] sm:$0xff] }
  0x16   :  { %v1385_v32 = vld [vmem:[%s1846_s1 + $0x8] sm:$0xff] }
  0x19   :  { %162 = vadd.xlane.f32.xlu0 %v161_v37  ;;  %114 = vadd.xlane.f32.xlu1 %v113_v38  ;;  %v67_v37 = vmul.f32 %v1380_v31, %v1380_v31  ;;  %v51_v38 = vmul.f32 %v1385_v32, %v1385_v32 }
  0x1d   :  { %159 = vadd.xlane.f32.xlu0 %v158_v43  ;;  %111 = vadd.xlane.f32.xlu1 %v110_v44  ;;  %v134_v43 = vsel %vm82_vm1, %v67_v37, 0.0  ;;  %v86_v44 = vsel %vm82_vm1, %v51_v38, 0.0 }
  0x21   :  { %156 = vadd.xlane.f32.xlu0 %v155_v49  ;;  %108 = vadd.xlane.f32.xlu1 %v107_v50  ;;  %v131_v49 = vsel %vm82_vm1, %v66_v45, 0.0  ;;  %v83_v50 = vsel %vm82_vm1, %v50_v46, 0.0 }
  0x25   :  { %153 = vadd.xlane.f32.xlu0 %v152_v55  ;;  %105 = vadd.xlane.f32.xlu1 %v104_v56  ;;  %v1418_v55 = vld [vmem:[%s1847_s0] sm:$0xff] }
  0x26   :  { %1067 = vmatprep.mubr.msk.f32.mxu0 %vm82_vm1, %v1418_v55 }
  0x29   :  { %150 = vadd.xlane.f32.xlu0 %v149_v61  ;;  %102 = vadd.xlane.f32.xlu1 %v101_v62 }
  0x2d   :  { %147 = vadd.xlane.f32.xlu0 %v146_v6  ;;  %99 = vadd.xlane.f32.xlu1 %v98_v8 }
  0x31   :  { %144 = vadd.xlane.f32.xlu0 %v143_v15  ;;  %96 = vadd.xlane.f32.xlu1 %v95_v16 }
  0x35   :  { %141 = vadd.xlane.f32.xlu0 %v140_v25  ;;  %93 = vadd.xlane.f32.xlu1 %v92_v26 }
  0x39   :  { %138 = vadd.xlane.f32.xlu0 %v137_v33  ;;  %90 = vadd.xlane.f32.xlu1 %v89_v34 }
  0x3d   :  { %135 = vadd.xlane.f32.xlu0 %v134_v43  ;;  %87 = vadd.xlane.f32.xlu1 %v86_v44 }
  0x41   :  { %132 = vadd.xlane.f32.xlu0 %v131_v49  ;;  %84 = vadd.xlane.f32.xlu1 %v83_v50 }
  0x45   :  { %453 = vmax.xlane.f32.xlu0 %v452_v52 }
  0x8e   :  { %v178_v56 = vpop.xlane.xlu0 %177  ;;  %v175_v57 = vpop.xlane.xlu1 %174 }
  0x8f   :  { %v210_v58 = vmax.f32 %v178_v56, 1e-24  ;;  %v209_v61 = vmax.f32 %v175_v57, 1e-24 }
  0x91   :  { %1072 = vrsqrt.f32 %v210_v58 }
  0x92   :  { %1074 = vrsqrt.f32 %v209_v61  ;;  %v130_v62 = vpop.xlane.xlu0 %129  ;;  %v127_v63 = vpop.xlane.xlu1 %126 }
  0x93   :  { %v194_v3 = vmax.f32 %v130_v62, 1e-24  ;;  %v193_v6 = vmax.f32 %v127_v63, 1e-24 }
  0x95   :  { %1076 = vrsqrt.f32 %v194_v3 }
  0x96   :  { %1078 = vrsqrt.f32 %v193_v6  ;;  %v172_v8 = vpop.xlane.xlu0 %171  ;;  %v124_v11 = vpop.xlane.xlu1 %123 }
  0x97   :  { %v208_v12 = vmax.f32 %v172_v8, 1e-24  ;;  %v192_v15 = vmax.f32 %v124_v11, 1e-24 }
  0x99   :  { %1080 = vrsqrt.f32 %v208_v12 }
  0x9a   :  { %1082 = vrsqrt.f32 %v192_v15  ;;  %v169_v16 = vpop.xlane.xlu0 %168  ;;  %v121_v19 = vpop.xlane.xlu1 %120 }
  0x9b   :  { %v207_v20 = vmax.f32 %v169_v16, 1e-24  ;;  %v191_v25 = vmax.f32 %v121_v19, 1e-24 }
  0x9d   :  { %1084 = vrsqrt.f32 %v207_v20 }
  0x9e   :  { %v1073_v26 = vpop.eup %1072  ;;  %1086 = vrsqrt.f32 %v191_v25  ;;  %v166_v27 = vpop.xlane.xlu0 %165 }
  0x9f   :  { %v118_v28 = vpop.xlane.xlu1 %117  ;;  %v1075_v33 = vpop.eup %1074  ;;  %v274_v34 = vmul.f32 %v1073_v26, %v1157_v0  ;;  %v206_v37 = vmax.f32 %v166_v27, 1e-24 }
  0xa0   :  { %v190_v38 = vmax.f32 %v118_v28, 1e-24  ;;  %v273_v45 = vmul.f32 %v1075_v33, %v1162_v1 }
  0xa1   :  { %1035 = vmatprep.subr.msk.mxu0 %vm82_vm1, %v274_v34  ;;  %1088 = vrsqrt.f32 %v206_v37 }
  0xa2   :  { %v1077_v43 = vpop.eup %1076  ;;  %1090 = vrsqrt.f32 %v190_v38  ;;  %v163_v44 = vpop.xlane.xlu0 %162 }
  0xa3   :  { %v115_v46 = vpop.xlane.xlu1 %114  ;;  %v1079_v49 = vpop.eup %1078  ;;  %v258_v50 = vmul.f32 %v1077_v43, %v1167_v2  ;;  %v205_v52 = vmax.f32 %v163_v44, 1e-24 }
  0xa4   :  { %v189_v56 = vmax.f32 %v115_v46, 1e-24  ;;  %v257_v0 = vmul.f32 %v1079_v49, %v1179_v7 }
  0xa5   :  { %1036 = vmatpush3.xpose.msk.msra.mxu0 %vm82_vm1, %v258_v50  ;;  %1092 = vrsqrt.f32 %v205_v52 }
  0xa6   :  { %v1081_v57 = vpop.eup %1080  ;;  %1037 = vmatprep.subr.msk.mxu0 %vm82_vm1, %v273_v45  ;;  %1094 = vrsqrt.f32 %v189_v56  ;;  %v160_v58 = vpop.xlane.xlu0 %159 }
  0xa7   :  { %v112_v61 = vpop.xlane.xlu1 %111  ;;  %v1083_v62 = vpop.eup %1082  ;;  %v204_v63 = vmax.f32 %v160_v58, 1e-24  ;;  %v272_v3 = vmul.f32 %v1081_v57, %v1186_v9 }
  0xa8   :  { %v188_v1 = vmax.f32 %v112_v61, 1e-24  ;;  %v256_v2 = vmul.f32 %v1083_v62, %v1191_v10 }
  0xa9   :  { %1096 = vrsqrt.f32 %v204_v63  ;;  %1038 = vmatpush3.xpose.msk.msra.mxu0 %vm82_vm1, %v257_v0 }
  0xaa   :  { %v1085_v6 = vpop.eup %1084  ;;  %1098 = vrsqrt.f32 %v188_v1  ;;  %1039 = vmatprep.subr.msk.mxu0 %vm82_vm1, %v272_v3  ;;  %v157_v7 = vpop.xlane.xlu0 %156 }
  0xab   :  { %v109_v8 = vpop.xlane.xlu1 %108  ;;  %v1087_v11 = vpop.eup %1086  ;;  %v203_v12 = vmax.f32 %v157_v7, 1e-24  ;;  %v271_v16 = vmul.f32 %v1085_v6, %v1204_v17 }
  0xac   :  { %v187_v15 = vmax.f32 %v109_v8, 1e-24  ;;  %v255_v9 = vmul.f32 %v1087_v11, %v1209_v18 }
  0xad   :  { %1100 = vrsqrt.f32 %v203_v12  ;;  %1040 = vmatpush3.xpose.msk.msra.mxu0 %vm82_vm1, %v256_v2 }
  0xae   :  { %v1089_v19 = vpop.eup %1088  ;;  %1102 = vrsqrt.f32 %v187_v15  ;;  %1041 = vmatprep.subr.msk.mxu0 %vm82_vm1, %v271_v16  ;;  %v154_v10 = vpop.xlane.xlu0 %153 }
  0xaf   :  { %v106_v20 = vpop.xlane.xlu1 %105  ;;  %v1091_v25 = vpop.eup %1090  ;;  %v202_v26 = vmax.f32 %v154_v10, 1e-24  ;;  %v270_v28 = vmul.f32 %v1089_v19, %v1220_v23 }
  0xb0   :  { %v186_v27 = vmax.f32 %v106_v20, 1e-24  ;;  %v254_v17 = vmul.f32 %v1091_v25, %v1225_v24 }
  0xb1   :  { %1104 = vrsqrt.f32 %v202_v26  ;;  %1042 = vmatpush3.xpose.msk.msra.mxu0 %vm82_vm1, %v255_v9 }
  0xb2   :  { %v1093_v33 = vpop.eup %1092  ;;  %1106 = vrsqrt.f32 %v186_v27  ;;  %1043 = vmatprep.subr.msk.mxu0 %vm82_vm1, %v270_v28  ;;  %v151_v18 = vpop.xlane.xlu0 %150 }
  0xb3   :  { %v103_v34 = vpop.xlane.xlu1 %102  ;;  %v1095_v37 = vpop.eup %1094  ;;  %v201_v38 = vmax.f32 %v151_v18, 1e-24  ;;  %v269_v44 = vmul.f32 %v1093_v33, %v1236_v29 }
  0xb4   :  { %v185_v43 = vmax.f32 %v103_v34, 1e-24  ;;  %v253_v23 = vmul.f32 %v1095_v37, %v1241_v30 }
  0xb5   :  { %1108 = vrsqrt.f32 %v201_v38  ;;  %1044 = vmatpush3.xpose.msk.msra.mxu0 %vm82_vm1, %v254_v17  ;;  %v449_v17 = vlaneseq }
  0xb6   :  { %v1097_v45 = vpop.eup %1096  ;;  %1110 = vrsqrt.f32 %v185_v43  ;;  %1045 = vmatprep.subr.msk.mxu0 %vm82_vm1, %v269_v44  ;;  %v148_v24 = vpop.xlane.xlu0 %147 }
  0xb7   :  { %v100_v46 = vpop.xlane.xlu1 %99  ;;  %v1099_v49 = vpop.eup %1098  ;;  %v200_v50 = vmax.f32 %v148_v24, 1e-24  ;;  %v268_v56 = vmul.f32 %v1097_v45, %v1252_v35  ;;  %v1466_v44 = vand.u32 127, %v449_v17 }
  0xb8   :  { %v184_v52 = vmax.f32 %v100_v46, 1e-24  ;;  %v252_v29 = vmul.f32 %v1099_v49, %v1257_v36 }
  0xb9   :  { %1112 = vrsqrt.f32 %v200_v50  ;;  %1046 = vmatpush3.xpose.msk.msra.mxu0 %vm82_vm1, %v253_v23 }
  0xba   :  { %v1101_v0 = vpop.eup %1100  ;;  %1114 = vrsqrt.f32 %v184_v52  ;;  %1047 = vmatprep.subr.msk.mxu0 %vm82_vm1, %v268_v56  ;;  %v145_v30 = vpop.xlane.xlu0 %144 }
  0xbb   :  { %v97_v57 = vpop.xlane.xlu1 %96  ;;  %v1103_v58 = vpop.eup %1102  ;;  %v199_v61 = vmax.f32 %v145_v30, 1e-24  ;;  %v267_v63 = vmul.f32 %v1101_v0, %v1268_v41 }
  0xbc   :  { %v183_v62 = vmax.f32 %v97_v57, 1e-24  ;;  %v251_v35 = vmul.f32 %v1103_v58, %v1273_v42 }
  0xbd   :  { %1116 = vrsqrt.f32 %v199_v61  ;;  %1048 = vmatpush3.xpose.msk.msra.mxu0 %vm82_vm1, %v252_v29 }
  0xbe   :  { %v1105_v1 = vpop.eup %1104  ;;  %1118 = vrsqrt.f32 %v183_v62  ;;  %1049 = vmatprep.subr.msk.mxu0 %vm82_vm1, %v267_v63  ;;  %v142_v36 = vpop.xlane.xlu0 %141 }
  0xbf   :  { %v94_v3 = vpop.xlane.xlu1 %93  ;;  %v1107_v2 = vpop.eup %1106  ;;  %v198_v6 = vmax.f32 %v142_v36, 1e-24  ;;  %v266_v8 = vmul.f32 %v1105_v1, %v1284_v47 }
  0xc0   :  { %v182_v7 = vmax.f32 %v94_v3, 1e-24  ;;  %v250_v41 = vmul.f32 %v1107_v2, %v1289_v48 }
  0xc1   :  { %1120 = vrsqrt.f32 %v198_v6  ;;  %1050 = vmatpush3.xpose.msk.msra.mxu0 %vm82_vm1, %v251_v35 }
  0xc2   :  { %v1109_v11 = vpop.eup %1108  ;;  %1122 = vrsqrt.f32 %v182_v7  ;;  %1051 = vmatprep.subr.msk.mxu0 %vm82_vm1, %v266_v8  ;;  %v139_v42 = vpop.xlane.xlu0 %138 }
  0xc3   :  { %v91_v12 = vpop.xlane.xlu1 %90  ;;  %v1111_v15 = vpop.eup %1110  ;;  %v197_v16 = vmax.f32 %v139_v42, 1e-24  ;;  %v265_v19 = vmul.f32 %v1109_v11, %v1300_v53  ;;  %v1137_v11 = vmov 0  }
  0xc4   :  { %v181_v9 = vmax.f32 %v91_v12, 1e-24  ;;  %v249_v47 = vmul.f32 %v1111_v15, %v1305_v54  ;;  %17 = vst.msk [vmem:[#allocation3] sm:$0xff] %vm15_vm0, %v1137_v11 }
  0xc5   :  { %1124 = vrsqrt.f32 %v197_v16  ;;  %1052 = vmatpush3.xpose.msk.msra.mxu0 %vm82_vm1, %v250_v41 }
  0xc6   :  { %v1113_v10 = vpop.eup %1112  ;;  %1126 = vrsqrt.f32 %v181_v9  ;;  %1053 = vmatprep.subr.msk.mxu0 %vm82_vm1, %v265_v19  ;;  %v136_v48 = vpop.xlane.xlu0 %135 }
  0xc7   :  { %v88_v20 = vpop.xlane.xlu1 %87  ;;  %v1115_v25 = vpop.eup %1114  ;;  %v196_v26 = vmax.f32 %v136_v48, 1e-24  ;;  %v264_v28 = vmul.f32 %v1113_v10, %v1316_v59 }
  0xc8   :  { %v180_v27 = vmax.f32 %v88_v20, 1e-24  ;;  %v248_v53 = vmul.f32 %v1115_v25, %v1321_v60 }
  0xc9   :  { %1128 = vrsqrt.f32 %v196_v26  ;;  %1054 = vmatpush3.xpose.msk.msra.mxu0 %vm82_vm1, %v249_v47 }
  0xca   :  { %v1117_v33 = vpop.eup %1116  ;;  %1130 = vrsqrt.f32 %v180_v27  ;;  %1055 = vmatprep.subr.msk.mxu0 %vm82_vm1, %v264_v28  ;;  %v133_v54 = vpop.xlane.xlu0 %132 }
  0xcb   :  { %v85_v18 = vpop.xlane.xlu1 %84  ;;  %v1119_v34 = vpop.eup %1118  ;;  %v195_v37 = vmax.f32 %v133_v54, 1e-24  ;;  %v263_v43 = vmul.f32 %v1117_v33, %v1332_v4 }
  0xcc   :  { %v179_v38 = vmax.f32 %v85_v18, 1e-24  ;;  %v247_v59 = vmul.f32 %v1119_v34, %v1337_v5 }
  0xcd   :  { %1132 = vrsqrt.f32 %v195_v37  ;;  %1056 = vmatpush3.xpose.msk.msra.mxu0 %vm82_vm1, %v248_v53 }
  0xce   :  { %v1121_v23 = vpop.eup %1120  ;;  %1134 = vrsqrt.f32 %v179_v38  ;;  %1057 = vmatprep.subr.msk.mxu0 %vm82_vm1, %v263_v43  ;;  %v1471_v60 = vpop.xlane.xlu0 %453 }
  0xcf   :  { %v1123_v45 = vpop.eup %1122  ;;  %v262_v24 = vmul.f32 %v1121_v23, %v1348_v13  ;;  %vm459_vm2 = vcmp.eq.f32.partialorder %v1411_v51, %v1471_v60 }
  0xd0   :  { %v460_v4 = vsel %vm459_vm2, %v1466_v44, 4  ;;  %v246_v46 = vmul.f32 %v1123_v45, %v1353_v14 }
  0xd1   :  { %1058 = vmatpush3.xpose.msk.msra.mxu0 %vm82_vm1, %v247_v59  ;;  %v461_v5 = vsel %vm15_vm0, %v460_v4, 2147483647 }
  0xd2   :  { %v1125_v49 = vpop.eup %1124  ;;  %1059 = vmatprep.subr.msk.mxu0 %vm82_vm1, %v262_v24  ;;  %v463_v50 = vshra.s32 %v461_v5, 16 }
  0xd3   :  { %v1127_v52 = vpop.eup %1126  ;;  %v261_v56 = vmul.f32 %v1125_v49, %v1364_v21 }
  0xd4   :  { %v465_v29 = vcvt.s32.f32 %v463_v50  ;;  %v245_v13 = vmul.f32 %v1127_v52, %v1369_v22 }
  0xd5   :  { %1060 = vmatpush3.xpose.msk.msra.mxu0 %vm82_vm1, %v246_v46 }
  0xd6   :  { %v1129_v0 = vpop.eup %1128  ;;  %1061 = vmatprep.subr.msk.mxu0 %vm82_vm1, %v261_v56  ;;  %466 = vmin.xlane.f32.xlu0 %v465_v29 }
  0xd7   :  { %v1131_v30 = vpop.eup %1130  ;;  %v260_v14 = vmul.f32 %v1129_v0, %v1380_v31  ;;  %v462_v31 = vand.u32 65535, %v461_v5 }
  0xd8   :  { %v244_v57 = vmul.f32 %v1131_v30, %v1385_v32 }
  0xd9   :  { %1062 = vmatpush3.xpose.msk.msra.mxu0 %vm82_vm1, %v245_v13  ;;  %v464_v62 = vcvt.s32.f32 %v462_v31 }
  0xda   :  { %v1133_v58 = vpop.eup %1132  ;;  %1063 = vmatprep.subr.msk.mxu0 %vm82_vm1, %v260_v14 }
  0xdb   :  { %v1135_v21 = vpop.eup %1134  ;;  %v259_v61 = vmul.f32 %v1133_v58, %v1396_v39 }
  0xdc   :  { %v243_v22 = vmul.f32 %v1135_v21, %v1401_v40 }
  0xdd   :  { %1064 = vmatpush3.xpose.msk.msra.mxu0 %vm82_vm1, %v244_v57 }
  0xde   :  { %1065 = vmatprep.subr.msk.mxu0 %vm82_vm1, %v259_v61 }
  0xe1   :  { %1066 = vmatpush3.xpose.msk.msra.mxu0 %vm82_vm1, %v243_v22 }
  0xe4   :  { %1068 = vmatmul.mubr.msk.f32.vlgmr.msra.gmra.mxu0 %vm82_vm1, %v1418_v55 }
 0x15f   :  { %v467_v32 = vpop.xlane.xlu0 %466 }
 0x160   :  { %vm468_vm3 = vcmp.eq.f32.partialorder %v465_v29, %v467_v32  ;;  %v473_v39 = vcvt.f32.s32 %v467_v32 }
 0x161   :  { %v469_v63 = vsel %vm468_vm3, %v464_v62, inf }
 0x162   :  { %470 = vmin.xlane.f32.xlu0 %v469_v63  ;;  %v474_v36 = vshll.u32 %v473_v39, 16 }
 0x1a4   :  { %v441_v35 = vpop.f32.mrf.mxu0 }
 0x1a5   :  { %455 = vmax.xlane.f32.xlu1 %v441_v35 }
 0x1eb   :  { %v471_v1 = vpop.xlane.xlu0 %470 }
 0x1ec   :  { %v472_v3 = vcvt.f32.s32 %v471_v1 }
 0x1ee   :  { %v1496_v40 = vadd.s32 %v474_v36, %v472_v3 }
 0x1f0   :  { %vm492_vm4 = vcmp.eq.s32.totalorder %v1466_v44, %v1496_v40 }
 0x22e   :  { %v1500_v2 = vpop.xlane.xlu1 %455 }
 0x22f   :  { %vm1851_vm5 = vcmp.ge.f32.partialorder %v1471_v60, %v1500_v2  ;;  %vm476_vm6 = vcmp.eq.f32.partialorder %v441_v35, %v1500_v2 }
 0x230   :  { %vm515_vm7 = vmand %vm1851_vm5, %vm492_vm4  ;;  %v477_v55 = vsel %vm476_vm6, %v1466_v44, 128 }
 0x231   :  { %v516_v6 = vsel %vm515_vm7, -inf, %v1411_v51  ;;  %v479_v7 = vshra.s32 %v477_v55, 16  ;;  %v478_v42 = vand.u32 65535, %v477_v55  ;;  %vm517_vm12 = vmxor %vm1851_vm5, %vm1138_vm11 }
 0x232   :  { %v523_v8 = vsel %vm15_vm0, %v516_v6, -inf }
 0x233   :  { %524 = vmax.xlane.f32.xlu0 %v523_v8  ;;  %v481_v41 = vcvt.s32.f32 %v479_v7  ;;  %v480_v16 = vcvt.s32.f32 %v478_v42 }
 0x235   :  { %482 = vmin.xlane.f32.xlu1 %v481_v41 }
 0x2bc   :  { %v1515_v12 = vpop.xlane.xlu0 %524 }
 0x2bd   :  { %vm530_vm8 = vcmp.eq.f32.partialorder %v516_v6, %v1515_v12 }
 0x2be   :  { %v483_v15 = vpop.xlane.xlu1 %482  ;;  %v531_v9 = vsel %vm530_vm8, %v1466_v44, 4 }
 0x2bf   :  { %vm484_vm9 = vcmp.eq.f32.partialorder %v481_v41, %v483_v15  ;;  %v532_v51 = vsel %vm15_vm0, %v531_v9, 2147483647  ;;  %v489_v48 = vcvt.f32.s32 %v483_v15 }
 0x2c0   :  { %v485_v19 = vsel %vm484_vm9, %v480_v16, inf  ;;  %v534_v47 = vshra.s32 %v532_v51, 16  ;;  %v533_v20 = vand.u32 65535, %v532_v51 }
 0x2c1   :  { %486 = vmin.xlane.f32.xlu1 %v485_v19  ;;  %v490_v26 = vshll.u32 %v489_v48, 16 }
 0x2c2   :  { %v536_v10 = vcvt.s32.f32 %v534_v47  ;;  %v535_v53 = vcvt.s32.f32 %v533_v20 }
 0x2c4   :  { %537 = vmin.xlane.f32.xlu0 %v536_v10 }
 0x34a   :  { %v487_v25 = vpop.xlane.xlu1 %486 }
 0x34b   :  { %v488_v27 = vcvt.f32.s32 %v487_v25  ;;  %v458_v25 = vmax.f32 %v1471_v60, %v1500_v2 }
 0x34d   :  { %v1520_v28 = vadd.s32 %v490_v26, %v488_v27  ;;  %v538_v17 = vpop.xlane.xlu0 %537 }
 0x34e   :  { %vm539_vm10 = vcmp.eq.f32.partialorder %v536_v10, %v538_v17  ;;  %v544_v18 = vcvt.f32.s32 %v538_v17 }
 0x34f   :  { %v540_v33 = vsel %vm539_vm10, %v535_v53, inf  ;;  %vm518_vm13 = vcmp.eq.s32.totalorder %v1466_v44, %v1520_v28 }
 0x350   :  { %541 = vmin.xlane.f32.xlu0 %v540_v33  ;;  %vm521_vm14 = vmand %vm517_vm12, %vm518_vm13  ;;  %v545_v37 = vshll.u32 %v544_v18, 16 }
 0x351   :  { %v522_v54 = vsel %vm521_vm14, -inf, %v441_v35 }
 0x352   :  { %526 = vmax.xlane.f32.xlu1 %v522_v54 }
 0x3d9   :  { %v542_v34 = vpop.xlane.xlu0 %541 }
 0x3da   :  { %v543_v38 = vcvt.f32.s32 %v542_v34 }
 0x3db   :  { %v1528_v43 = vpop.xlane.xlu1 %526 }
 0x3dc   :  { %v1530_v59 = vadd.s32 %v545_v37, %v543_v38  ;;  %vm547_vm15 = vcmp.eq.f32.partialorder %v522_v54, %v1528_v43  ;;  %vm1850_vm2 = vcmp.ge.f32.partialorder %v1515_v12, %v1528_v43  ;;  %v529_v26 = vmax.f32 %v1515_v12, %v1528_v43 }
 0x3dd   :  { %v548_v23 = vsel %vm547_vm15, %v1466_v44, 128  ;;  %vm587_vm8 = vmxor %vm1850_vm2, %vm1138_vm11 }
 0x3de   :  { %vm563_vm1 = vcmp.eq.s32.totalorder %v1466_v44, %v1530_v59  ;;  %v550_v45 = vshra.s32 %v548_v23, 16  ;;  %v549_v5 = vand.u32 65535, %v548_v23  ;;  %v443_v23 = vpop.f32.mrf.mxu0 }
 0x3df   :  { %vm585_vm3 = vmand %vm1850_vm2, %vm563_vm1 }
 0x3e0   :  { %v552_v24 = vcvt.s32.f32 %v550_v45  ;;  %v586_v4 = vsel %vm585_vm3, -inf, %v516_v6  ;;  %v551_v52 = vcvt.s32.f32 %v549_v5 }
 0x3e1   :  { %v593_v46 = vsel %vm15_vm0, %v586_v4, -inf }
 0x3e2   :  { %553 = vmin.xlane.f32.xlu1 %v552_v24  ;;  %594 = vmax.xlane.f32.xlu0 %v593_v46 }
 0x46b   :  { %v554_v49 = vpop.xlane.xlu1 %553  ;;  %v1545_v50 = vpop.xlane.xlu0 %594 }
 0x46c   :  { %vm600_vm6 = vcmp.eq.f32.partialorder %v586_v4, %v1545_v50  ;;  %vm555_vm7 = vcmp.eq.f32.partialorder %v552_v24, %v554_v49  ;;  %v560_v14 = vcvt.f32.s32 %v554_v49 }
 0x46d   :  { %v556_v56 = vsel %vm555_vm7, %v551_v52, inf  ;;  %v601_v29 = vsel %vm600_vm6, %v1466_v44, 4 }
 0x46e   :  { %557 = vmin.xlane.f32.xlu1 %v556_v56  ;;  %v602_v13 = vsel %vm15_vm0, %v601_v29, 2147483647  ;;  %v561_v58 = vshll.u32 %v560_v14, 16 }
 0x46f   :  { %v604_v0 = vshra.s32 %v602_v13, 16  ;;  %v603_v61 = vand.u32 65535, %v602_v13 }
 0x471   :  { %v606_v30 = vcvt.s32.f32 %v604_v0  ;;  %v605_v62 = vcvt.s32.f32 %v603_v61 }
 0x473   :  { %607 = vmin.xlane.f32.xlu0 %v606_v30 }
 0x4f7   :  { %v558_v57 = vpop.xlane.xlu1 %557 }
 0x4f8   :  { %v559_v21 = vcvt.f32.s32 %v558_v57 }
 0x4fa   :  { %v1550_v22 = vadd.s32 %v561_v58, %v559_v21 }
 0x4fc   :  { %v608_v31 = vpop.xlane.xlu0 %607  ;;  %vm588_vm9 = vcmp.eq.s32.totalorder %v1466_v44, %v1550_v22 }
 0x4fd   :  { %vm591_vm10 = vmand %vm587_vm8, %vm588_vm9  ;;  %vm609_vm12 = vcmp.eq.f32.partialorder %v606_v30, %v608_v31  ;;  %v614_v35 = vcvt.f32.s32 %v608_v31 }
 0x4fe   :  { %v592_v32 = vsel %vm591_vm10, -inf, %v522_v54  ;;  %v610_v63 = vsel %vm609_vm12, %v605_v62, inf  ;;  %vm510_vm10 = vcmp.eq.s32.totalorder %v1466_v44, 0  ;;  %vm580_vm12 = vcmp.eq.s32.totalorder %v1466_v44, 1 }
 0x4ff   :  { %596 = vmax.xlane.f32.xlu1 %v592_v32  ;;  %611 = vmin.xlane.f32.xlu0 %v610_v63  ;;  %v615_v36 = vshll.u32 %v614_v35, 16  ;;  %v511_v17 = vsel %vm510_vm10, %v458_v25, -inf }
 0x500   :  { %v581_v18 = vsel %vm580_vm12, %v529_v26, %v511_v17 }
 0x588   :  { %v1558_v39 = vpop.xlane.xlu1 %596  ;;  %v612_v1 = vpop.xlane.xlu0 %611 }
 0x589   :  { %vm617_vm13 = vcmp.eq.f32.partialorder %v592_v32, %v1558_v39  ;;  %v613_v3 = vcvt.f32.s32 %v612_v1  ;;  %vm1849_vm14 = vcmp.ge.f32.partialorder %v1545_v50, %v1558_v39  ;;  %v599_v27 = vmax.f32 %v1545_v50, %v1558_v39 }
 0x58a   :  { %v618_v55 = vsel %vm617_vm13, %v1466_v44, 128  ;;  %vm657_vm7 = vmxor %vm1849_vm14, %vm1138_vm11  ;;  %vm650_vm13 = vcmp.eq.s32.totalorder %v1466_v44, 2 }
 0x58b   :  { %v1562_v6 = vadd.s32 %v615_v36, %v613_v3  ;;  %v620_v7 = vshra.s32 %v618_v55, 16  ;;  %v619_v42 = vand.u32 65535, %v618_v55  ;;  %v651_v34 = vsel %vm650_vm13, %v599_v27, %v581_v18 }
 0x58d   :  { %v622_v8 = vcvt.s32.f32 %v620_v7  ;;  %vm633_vm15 = vcmp.eq.s32.totalorder %v1466_v44, %v1562_v6  ;;  %v621_v16 = vcvt.s32.f32 %v619_v42 }
 0x58e   :  { %vm655_vm3 = vmand %vm1849_vm14, %vm633_vm15 }
 0x58f   :  { %623 = vmin.xlane.f32.xlu1 %v622_v8  ;;  %v1574_v41 = vsel %vm655_vm3, -inf, %v586_v4  ;;  %vm1854_vm3 = vcmp.eq.s32.totalorder %v1466_v44, 3 }
 0x590   :  { %v663_v11 = vsel %vm15_vm0, %v1574_v41, -inf }
 0x591   :  { %664 = vmax.xlane.f32.xlu0 %v663_v11 }
 0x618   :  { %v624_v15 = vpop.xlane.xlu1 %623 }
 0x619   :  { %vm625_vm6 = vcmp.eq.f32.partialorder %v622_v8, %v624_v15  ;;  %v630_v51 = vcvt.f32.s32 %v624_v15 }
 0x61a   :  { %v626_v9 = vsel %vm625_vm6, %v621_v16, inf  ;;  %v1600_v53 = vpop.xlane.xlu0 %664 }
 0x61b   :  { %627 = vmin.xlane.f32.xlu1 %v626_v9  ;;  %v631_v47 = vshll.u32 %v630_v51, 16 }
 0x6a4   :  { %v628_v19 = vpop.xlane.xlu1 %627 }
 0x6a5   :  { %v629_v10 = vcvt.f32.s32 %v628_v19 }
 0x6a7   :  { %v1578_v48 = vadd.s32 %v631_v47, %v629_v10 }
 0x6a9   :  { %vm658_vm8 = vcmp.eq.s32.totalorder %v1466_v44, %v1578_v48 }
 0x6aa   :  { %vm661_vm9 = vmand %vm657_vm7, %vm658_vm8 }
 0x6ab   :  { %v1586_v20 = vsel %vm661_vm9, -inf, %v592_v32 }
 0x6ac   :  { %666 = vmax.xlane.f32.xlu1 %v1586_v20 }
 0x735   :  { %v1602_v33 = vpop.xlane.xlu1 %666 }
 0x736   :  { %v669_v54 = vmax.f32 %v1600_v53, %v1602_v33 }
 0x738   :  { %v721_v37 = vsel %vm1854_vm3, %v669_v54, %v651_v34 }
 0x739   :  { %v724_v38 = vsel %vm15_vm0, %v721_v37, -inf }
 0x73a   :  { %725 = vmax.xlane.f32.xlu0 %v724_v38 }
 0x73e   :  { %727 = vmax.xlane.f32.xlu0 %v443_v23 }
 0x7c3   :  { %v1614_v45 = vpop.xlane.xlu0 %725 }
 0x7c4   :  { %vm731_vm6 = vcmp.eq.f32.partialorder %v721_v37, %v1614_v45 }
 0x7c5   :  { %v732_v24 = vsel %vm731_vm6, %v1466_v44, 4 }
 0x7c6   :  { %v733_v4 = vsel %vm15_vm0, %v732_v24, 2147483647 }
 0x7c7   :  { %v1619_v46 = vpop.xlane.xlu0 %727  ;;  %v735_v5 = vshra.s32 %v733_v4, 16  ;;  %v734_v13 = vand.u32 65535, %v733_v4 }
 0x7c8   :  { %vm748_vm7 = vcmp.eq.f32.partialorder %v443_v23, %v1619_v46  ;;  %vm1852_vm6 = vcmp.ge.f32.partialorder %v1614_v45, %v1619_v46 }
 0x7c9   :  { %v737_v49 = vcvt.s32.f32 %v735_v5  ;;  %v749_v52 = vsel %vm748_vm7, %v1466_v44, 128  ;;  %v736_v14 = vcvt.s32.f32 %v734_v13 }
 0x7ca   :  { %v751_v56 = vshra.s32 %v749_v52, 16  ;;  %v750_v0 = vand.u32 65535, %v749_v52 }
 0x7cb   :  { %738 = vmin.xlane.f32.xlu1 %v737_v49 }
 0x7cc   :  { %v753_v29 = vcvt.s32.f32 %v751_v56  ;;  %v752_v21 = vcvt.s32.f32 %v750_v0 }
 0x7ce   :  { %754 = vmin.xlane.f32.xlu0 %v753_v29 }
 0x854   :  { %v739_v30 = vpop.xlane.xlu1 %738 }
 0x855   :  { %vm740_vm8 = vcmp.eq.f32.partialorder %v737_v49, %v739_v30  ;;  %v745_v31 = vcvt.f32.s32 %v739_v30 }
 0x856   :  { %v741_v57 = vsel %vm740_vm8, %v736_v14, inf }
 0x857   :  { %742 = vmin.xlane.f32.xlu1 %v741_v57  ;;  %v755_v58 = vpop.xlane.xlu0 %754  ;;  %v746_v63 = vshll.u32 %v745_v31, 16 }
 0x858   :  { %vm756_vm9 = vcmp.eq.f32.partialorder %v753_v29, %v755_v58  ;;  %v761_v62 = vcvt.f32.s32 %v755_v58 }
 0x859   :  { %v757_v61 = vsel %vm756_vm9, %v752_v21, inf  ;;  %vm788_vm9 = vmxor %vm1852_vm6, %vm1138_vm11 }
 0x85a   :  { %758 = vmin.xlane.f32.xlu0 %v757_v61  ;;  %v762_v3 = vshll.u32 %v761_v62, 16 }
 0x8e0   :  { %v743_v32 = vpop.xlane.xlu1 %742 }
 0x8e1   :  { %v744_v35 = vcvt.f32.s32 %v743_v32 }
 0x8e3   :  { %v1623_v1 = vadd.s32 %v746_v63, %v744_v35  ;;  %v759_v36 = vpop.xlane.xlu0 %758 }
 0x8e4   :  { %v760_v55 = vcvt.f32.s32 %v759_v36 }
 0x8e5   :  { %vm1853_vm7 = vcmp.eq.s32.totalorder %v1466_v44, %v1623_v1 }
 0x8e6   :  { %v1629_v7 = vadd.s32 %v762_v3, %v760_v55  ;;  %vm786_vm8 = vmand %vm1852_vm6, %vm1853_vm7 }
 0x8e7   :  { %v787_v8 = vsel %vm786_vm8, -inf, %v721_v37 }
 0x8e8   :  { %v794_v11 = vsel %vm15_vm0, %v787_v8, -inf  ;;  %vm789_vm14 = vcmp.eq.s32.totalorder %v1466_v44, %v1629_v7 }
 0x8e9   :  { %795 = vmax.xlane.f32.xlu1 %v794_v11  ;;  %vm792_vm2 = vmand %vm788_vm9, %vm789_vm14 }
 0x8ea   :  { %v793_v42 = vsel %vm792_vm2, -inf, %v443_v23 }
 0x8eb   :  { %797 = vmax.xlane.f32.xlu0 %v793_v42 }
 0x972   :  { %v1644_v15 = vpop.xlane.xlu1 %795 }
 0x973   :  { %vm801_vm5 = vcmp.eq.f32.partialorder %v787_v8, %v1644_v15 }
 0x974   :  { %v1647_v16 = vpop.xlane.xlu0 %797  ;;  %v802_v9 = vsel %vm801_vm5, %v1466_v44, 4 }
 0x975   :  { %vm818_vm8 = vcmp.eq.f32.partialorder %v793_v42, %v1647_v16  ;;  %v803_v51 = vsel %vm15_vm0, %v802_v9, 2147483647  ;;  %vm799_vm14 = vcmp.ge.f32.partialorder %v1644_v15, %v1647_v16 }
 0x976   :  { %v805_v19 = vshra.s32 %v803_v51, 16  ;;  %v819_v47 = vsel %vm818_vm8, %v1466_v44, 128  ;;  %v804_v27 = vand.u32 65535, %v803_v51  ;;  %vm857_vm8 = vmxor %vm799_vm14, %vm1138_vm11 }
 0x977   :  { %v821_v10 = vshra.s32 %v819_v47, 16  ;;  %v820_v17 = vand.u32 65535, %v819_v47 }
 0x978   :  { %v807_v25 = vcvt.s32.f32 %v805_v19  ;;  %v806_v18 = vcvt.s32.f32 %v804_v27 }
 0x979   :  { %v823_v26 = vcvt.s32.f32 %v821_v10  ;;  %v822_v37 = vcvt.s32.f32 %v820_v17 }
 0x97a   :  { %808 = vmin.xlane.f32.xlu1 %v807_v25 }
 0x97b   :  { %824 = vmin.xlane.f32.xlu0 %v823_v26 }
 0xa03   :  { %v809_v54 = vpop.xlane.xlu1 %808 }
 0xa04   :  { %v825_v34 = vpop.xlane.xlu0 %824  ;;  %vm810_vm2 = vcmp.eq.f32.partialorder %v807_v25, %v809_v54  ;;  %v815_v24 = vcvt.f32.s32 %v809_v54 }
 0xa05   :  { %v811_v38 = vsel %vm810_vm2, %v806_v18, inf  ;;  %vm826_vm5 = vcmp.eq.f32.partialorder %v823_v26, %v825_v34  ;;  %v831_v4 = vcvt.f32.s32 %v825_v34 }
 0xa06   :  { %812 = vmin.xlane.f32.xlu1 %v811_v38  ;;  %v827_v23 = vsel %vm826_vm5, %v822_v37, inf  ;;  %v816_v49 = vshll.u32 %v815_v24, 16 }
 0xa07   :  { %828 = vmin.xlane.f32.xlu0 %v827_v23  ;;  %v832_v29 = vshll.u32 %v831_v4, 16 }
 0xa8f   :  { %v813_v5 = vpop.xlane.xlu1 %812 }
 0xa90   :  { %v814_v52 = vcvt.f32.s32 %v813_v5  ;;  %v829_v56 = vpop.xlane.xlu0 %828 }
 0xa91   :  { %v830_v13 = vcvt.f32.s32 %v829_v56 }
 0xa92   :  { %v1655_v0 = vadd.s32 %v816_v49, %v814_v52  ;;  %v448_v49 = vld [vmem:[#allocation3] sm:$0xff] }
 0xa93   :  { %v1657_v30 = vadd.s32 %v832_v29, %v830_v13  ;;  %v564_v29 = vsel %vm563_vm1, %v448_v49, 0 }
 0xa94   :  { %vm834_vm9 = vcmp.eq.s32.totalorder %v1466_v44, %v1655_v0 }
 0xa95   :  { %vm858_vm2 = vcmp.eq.s32.totalorder %v1466_v44, %v1657_v30  ;;  %vm855_vm5 = vmand %vm799_vm14, %vm834_vm9 }
 0xa96   :  { %vm861_vm6 = vmand %vm857_vm8, %vm858_vm2  ;;  %v856_v14 = vsel %vm855_vm5, -inf, %v787_v8 }
 0xa97   :  { %v1673_v57 = vsel %vm861_vm6, -inf, %v793_v42  ;;  %v863_v58 = vsel %vm15_vm0, %v856_v14, -inf  ;;  %vm670_vm6 = vcmp.eq.f32.partialorder %v1574_v41, %v1600_v53 }
 0xa98   :  { %866 = vmax.xlane.f32.xlu0 %v1673_v57  ;;  %864 = vmax.xlane.f32.xlu1 %v863_v58  ;;  %v671_v55 = vsel %vm670_vm6, %v1466_v44, 4 }
 0xa99   :  { %v672_v11 = vsel %vm15_vm0, %v671_v55, 2147483647 }
 0xa9a   :  { %v674_v51 = vshra.s32 %v672_v11, 16  ;;  %v673_v4 = vand.u32 65535, %v672_v11  ;;  %v493_v11 = vsel %vm492_vm4, %v448_v49, 0 }
 0xa9c   :  { %v676_v25 = vcvt.s32.f32 %v674_v51 }
 0xb21   :  { %v1677_v21 = vpop.xlane.xlu0 %866  ;;  %v1679_v61 = vpop.xlane.xlu1 %864 }
 0xb22   :  { %vm887_vm7 = vcmp.eq.f32.partialorder %v1673_v57, %v1677_v21  ;;  %vm870_vm3 = vcmp.eq.f32.partialorder %v856_v14, %v1679_v61  ;;  %vm868_vm2 = vcmp.ge.f32.partialorder %v1679_v61, %v1677_v21 }
 0xb23   :  { %v888_v31 = vsel %vm887_vm7, %v1466_v44, 128  ;;  %v871_v62 = vsel %vm870_vm3, %v1466_v44, 4  ;;  %vm687_vm3 = vcmp.eq.f32.partialorder %v1586_v20, %v1602_v33  ;;  %vm926_vm1 = vmxor %vm868_vm2, %vm1138_vm11 }
 0xb24   :  { %v890_v32 = vshra.s32 %v888_v31, 16  ;;  %v872_v63 = vsel %vm15_vm0, %v871_v62, 2147483647  ;;  %v889_v10 = vand.u32 65535, %v888_v31  ;;  %v1694_v26 = vsel %vm687_vm3, %v1466_v44, 128 }
 0xb25   :  { %v874_v35 = vshra.s32 %v872_v63, 16  ;;  %v873_v8 = vand.u32 65535, %v872_v63  ;;  %v690_v27 = vshra.s32 %v1694_v26, 16  ;;  %v675_v31 = vcvt.s32.f32 %v673_v4 }
 0xb26   :  { %v892_v36 = vcvt.s32.f32 %v890_v32  ;;  %v891_v41 = vcvt.s32.f32 %v889_v10  ;;  %v565_v32 = vsel %vm15_vm0, %v564_v29, 0  ;;  %v800_v10 = vmax.f32 %v1644_v15, %v1647_v16 }
 0xb27   :  { %v876_v3 = vcvt.s32.f32 %v874_v35  ;;  %v875_v9 = vcvt.s32.f32 %v873_v8  ;;  %v1697_v54 = vcvt.s32.f32 %v690_v27  ;;  %v567_v59 = vshrl.u32 %v565_v32, 16 }
 0xb28   :  { %893 = vmin.xlane.f32.xlu0 %v892_v36 }
 0xb29   :  { %877 = vmin.xlane.f32.xlu1 %v876_v3 }
 0xbb1   :  { %v894_v47 = vpop.xlane.xlu0 %893 }
 0xbb2   :  { %v878_v42 = vpop.xlane.xlu1 %877  ;;  %vm895_vm8 = vcmp.eq.f32.partialorder %v892_v36, %v894_v47  ;;  %v900_v24 = vcvt.f32.s32 %v894_v47  ;;  %v494_v47 = vsel %vm15_vm0, %v493_v11, 0 }
 0xbb3   :  { %vm879_vm7 = vcmp.eq.f32.partialorder %v876_v3, %v878_v42  ;;  %v896_v17 = vsel %vm895_vm8, %v891_v41, inf  ;;  %v884_v18 = vcvt.f32.s32 %v878_v42  ;;  %v569_v3 = vcvt.s32.f32 %v567_v59 }
 0xbb4   :  { %v880_v19 = vsel %vm879_vm7, %v875_v9, inf  ;;  %v901_v13 = vshll.u32 %v900_v24, 16  ;;  %v869_v41 = vmax.f32 %v1679_v61, %v1677_v21  ;;  %v495_v29 = vand.u32 65535, %v494_v47 }
 0xbb5   :  { %881 = vmin.xlane.f32.xlu1 %v880_v19  ;;  %v885_v34 = vshll.u32 %v884_v18, 16 }
 0xbb9   :  { %677 = vmin.xlane.f32.xlu1 %v676_v25 }
 0xbbd   :  { %897 = vmin.xlane.f32.xlu1 %v896_v17 }
 0xbc1   :  { %693 = vmin.xlane.f32.xlu1 %v1697_v54 }
 0xc3e   :  { %v882_v20 = vpop.xlane.xlu1 %881 }
 0xc3f   :  { %v883_v37 = vcvt.f32.s32 %v882_v20  ;;  %v496_v20 = vshrl.u32 %v494_v47, 16 }
 0xc41   :  { %v1700_v38 = vadd.s32 %v885_v34, %v883_v37 }
 0xc42   :  { %v678_v23 = vpop.xlane.xlu1 %677 }
 0xc43   :  { %vm903_vm5 = vcmp.eq.s32.totalorder %v1466_v44, %v1700_v38  ;;  %vm679_vm7 = vcmp.eq.f32.partialorder %v676_v25, %v678_v23  ;;  %v684_v42 = vcvt.f32.s32 %v678_v23 }
 0xc44   :  { %vm924_vm6 = vmand %vm868_vm2, %vm903_vm5  ;;  %v680_v63 = vsel %vm679_vm7, %v675_v31, inf }
 0xc45   :  { %v925_v5 = vsel %vm924_vm6, -inf, %v856_v14  ;;  %v634_v14 = vsel %vm633_vm15, %v448_v49, 0  ;;  %v685_v27 = vshll.u32 %v684_v42, 16  ;;  %vm1855_vm6 = vcmp.eq.s32.totalorder %v1466_v44, 3 }
 0xc46   :  { %v898_v52 = vpop.xlane.xlu1 %897  ;;  %v932_v56 = vsel %vm15_vm0, %v925_v5, -inf  ;;  %v635_v36 = vsel %vm15_vm0, %v634_v14, 0  ;;  %v497_v14 = vcvt.s32.f32 %v495_v29 }
 0xc47   :  { %v899_v58 = vcvt.f32.s32 %v898_v52  ;;  %933 = vmax.xlane.f32.xlu0 %v932_v56  ;;  %v637_v55 = vshrl.u32 %v635_v36, 16  ;;  %v498_v56 = vcvt.s32.f32 %v496_v20  ;;  %v636_v11 = vand.u32 65535, %v635_v36 }
 0xc49   :  { %v1716_v62 = vadd.s32 %v901_v13, %v899_v58  ;;  %v639_v6 = vcvt.s32.f32 %v637_v55  ;;  %v638_v42 = vcvt.s32.f32 %v636_v11 }
 0xc4a   :  { %v1739_v51 = vpop.xlane.xlu1 %693 }
 0xc4b   :  { %681 = vmin.xlane.f32.xlu0 %v680_v63  ;;  %vm927_vm3 = vcmp.eq.s32.totalorder %v1466_v44, %v1716_v62  ;;  %v689_v63 = vand.u32 65535, %v1694_v26  ;;  %vm695_vm7 = vcmp.eq.f32.partialorder %v1697_v54, %v1739_v51 }
 0xc4c   :  { %vm930_vm8 = vmand %vm926_vm1, %vm927_vm3 }
 0xc4d   :  { %v931_v35 = vsel %vm930_vm8, -inf, %v1673_v57  ;;  %v730_v57 = vmax.f32 %v1614_v45, %v1619_v46  ;;  %v691_v55 = vcvt.s32.f32 %v689_v63  ;;  %vm1856_vm8 = vcmp.ge.f32.partialorder %v1471_v60, %v1500_v2 }
 0xc4e   :  { %935 = vmax.xlane.f32.xlu1 %v931_v35 }
 0xc4f   :  { %v782_v34 = vsel %vm510_vm10, %v730_v57, -inf }
 0xc50   :  { %v851_v24 = vsel %vm580_vm12, %v800_v10, %v782_v34 }
 0xc52   :  { %572 = vadd.xlane.f32.xlu1 %v569_v3  ;;  %v566_v3 = vand.u32 65535, %v565_v32 }
 0xc56   :  { %642 = vadd.xlane.f32.xlu1 %v639_v6  ;;  %v568_v6 = vcvt.s32.f32 %v566_v3 }
 0xcd0   :  { %v1730_v8 = vpop.xlane.xlu0 %933 }
 0xcd1   :  { %vm939_vm11 = vcmp.eq.f32.partialorder %v925_v5, %v1730_v8  ;;  %v920_v5 = vsel %vm650_vm13, %v869_v41, %v851_v24 }
 0xcd2   :  { %v940_v9 = vsel %vm939_vm11, %v1466_v44, 4  ;;  %vm1857_vm11 = vcmp.ge.f32.partialorder %v1515_v12, %v1528_v43 }
 0xcd3   :  { %v941_v19 = vsel %vm15_vm0, %v940_v9, 2147483647 }
 0xcd4   :  { %v682_v25 = vpop.xlane.xlu0 %681  ;;  %v943_v40 = vshra.s32 %v941_v19, 16  ;;  %v942_v54 = vand.u32 65535, %v941_v19 }
 0xcd5   :  { %v683_v17 = vcvt.f32.s32 %v682_v25 }
 0xcd6   :  { %v945_v18 = vcvt.s32.f32 %v943_v40 }
 0xcd7   :  { %v686_v37 = vadd.s32 %v685_v27, %v683_v17  ;;  %v1749_v23 = vpop.xlane.xlu1 %935 }
 0xcd8   :  { %vm937_vm4 = vcmp.ge.f32.partialorder %v1730_v8, %v1749_v23  ;;  %v938_v4 = vmax.f32 %v1730_v8, %v1749_v23  ;;  %946 = vmin.xlane.f32.xlu0 %v945_v18  ;;  %vm956_vm1 = vcmp.eq.f32.partialorder %v931_v35, %v1749_v23  ;;  %v944_v35 = vcvt.s32.f32 %v942_v54 }
 0xcd9   :  { %vm703_vm15 = vcmp.eq.s32.totalorder %v1466_v44, %v686_v37  ;;  %v1769_v26 = vsel %vm956_vm1, %v1466_v44, 128  ;;  %vm1860_vm1 = vcmp.eq.s32.totalorder %v1466_v44, %v1623_v1 }
 0xcda   :  { %v989_v52 = vsel %vm1855_vm6, %v938_v4, %v920_v5  ;;  %v704_v13 = vsel %vm703_vm15, %v448_v49, 0  ;;  %v696_v49 = vsel %vm695_vm7, %v691_v55, inf  ;;  %v959_v57 = vshra.s32 %v1769_v26, 16 }
 0xcdb   :  { %991 = vst.msk [vmem:[#allocation2] sm:$0xff] %vm15_vm0, %v989_v52  ;;  %v705_v58 = vsel %vm15_vm0, %v704_v13, 0  ;;  %v573_v36 = vpop.xlane.xlu1 %572  ;;  %vm1858_vm15 = vcmp.ge.f32.partialorder %v1545_v50, %v1558_v39  ;;  %vm668_vm6 = vcmp.ge.f32.partialorder %v1600_v53, %v1602_v33  ;;  %vm1859_vm7 = vcmp.eq.s32.totalorder %v1466_v44, 3 }
 0xcdc   :  { %501 = vadd.xlane.f32.xlu0 %v498_v56  ;;  %v707_v31 = vshrl.u32 %v705_v58, 16  ;;  %v706_v9 = vand.u32 65535, %v705_v58  ;;  %v1772_v47 = vcvt.s32.f32 %v959_v57  ;;  %v575_v34 = vcvt.f32.s32 %v573_v36 }
 0xcdd   :  { %v700_v56 = vcvt.f32.s32 %v1739_v51 }
 0xcde   :  { %v709_v59 = vcvt.s32.f32 %v707_v31  ;;  %v708_v32 = vcvt.s32.f32 %v706_v9  ;;  %v576_v19 = vshll.u32 %v575_v34, 16 }
 0xcdf   :  { %v643_v41 = vpop.xlane.xlu1 %642  ;;  %v701_v11 = vshll.u32 %v700_v56, 16 }
 0xce0   :  { %499 = vadd.xlane.f32.xlu0 %v497_v14  ;;  %712 = vadd.xlane.f32.xlu1 %v709_v59  ;;  %v645_v4 = vcvt.f32.s32 %v643_v41  ;;  %v958_v41 = vand.u32 65535, %v1769_v26 }
 0xce4   :  { %570 = vadd.xlane.f32.xlu0 %v568_v6  ;;  %697 = vmin.xlane.f32.xlu1 %v696_v49 }
 0xce8   :  { %640 = vadd.xlane.f32.xlu0 %v638_v42 }
 0xcec   :  { %710 = vadd.xlane.f32.xlu0 %v708_v32 }
 0xcf0   :  { %962 = vmin.xlane.f32.xlu0 %v1772_v47 }
 0xd61   :  { %v1775_v10 = vpop.xlane.xlu0 %946 }
 0xd62   :  { %vm948_vm3 = vcmp.eq.f32.partialorder %v945_v18, %v1775_v10  ;;  %v646_v18 = vshll.u32 %v645_v4, 16 }
 0xd63   :  { %v949_v25 = vsel %vm948_vm3, %v944_v35, inf  ;;  %vm1861_vm3 = vcmp.ge.f32.partialorder %v1614_v45, %v1619_v46 }
 0xd64   :  { %950 = vmin.xlane.f32.xlu1 %v949_v25 }
 0xd65   :  { %v502_v40 = vpop.xlane.xlu0 %501 }
 0xd66   :  { %v504_v17 = vcvt.f32.s32 %v502_v40 }
 0xd68   :  { %v505_v52 = vshll.u32 %v504_v17, 16 }
 0xd69   :  { %v500_v27 = vpop.xlane.xlu0 %499  ;;  %v713_v20 = vpop.xlane.xlu1 %712 }
 0xd6a   :  { %v503_v37 = vcvt.f32.s32 %v500_v27  ;;  %v715_v31 = vcvt.f32.s32 %v713_v20  ;;  %v960_v20 = vcvt.s32.f32 %v958_v41 }
 0xd6c   :  { %v506_v29 = vadd.s32 %v505_v52, %v503_v37  ;;  %v716_v49 = vshll.u32 %v715_v31, 16 }
 0xd6d   :  { %v571_v24 = vpop.xlane.xlu0 %570  ;;  %v698_v13 = vpop.xlane.xlu1 %697 }
 0xd6e   :  { %v574_v5 = vcvt.f32.s32 %v571_v24  ;;  %v699_v59 = vcvt.f32.s32 %v698_v13  ;;  %v509_v55 = vsel %vm1856_vm8, %v506_v29, %v1520_v28 }
 0xd6f   :  { %v512_v32 = vsel %vm510_vm10, %v509_v55, 0 }
 0xd70   :  { %v577_v63 = vadd.s32 %v576_v19, %v574_v5  ;;  %v702_v57 = vadd.s32 %v701_v11, %v699_v59  ;;  %v953_v5 = vcvt.f32.s32 %v1775_v10 }
 0xd71   :  { %v641_v58 = vpop.xlane.xlu0 %640 }
 0xd72   :  { %v644_v14 = vcvt.f32.s32 %v641_v58  ;;  %v579_v51 = vsel %vm1857_vm11, %v577_v63, %v1550_v22  ;;  %v954_v19 = vshll.u32 %v953_v5, 16 }
 0xd73   :  { %v582_v2 = vsel %vm580_vm12, %v579_v51, %v512_v32  ;;  %v780_v51 = vadd.s32 128, %v1629_v7 }
 0xd74   :  { %v647_v3 = vadd.s32 %v646_v18, %v644_v14 }
 0xd75   :  { %v711_v6 = vpop.xlane.xlu0 %710 }
 0xd76   :  { %v714_v42 = vcvt.f32.s32 %v711_v6  ;;  %v649_v9 = vsel %vm1858_vm15, %v647_v3, %v1578_v48 }
 0xd77   :  { %v652_v12 = vsel %vm650_vm13, %v649_v9, %v582_v2 }
 0xd78   :  { %v717_v60 = vadd.s32 %v716_v49, %v714_v42 }
 0xd79   :  { %v963_v1 = vpop.xlane.xlu0 %962 }
 0xd7a   :  { %v719_v28 = vsel %vm668_vm6, %v717_v60, %v702_v57 }
 0xd7b   :  { %v722_v43 = vsel %vm1859_vm7, %v719_v28, %v652_v12  ;;  %v849_v12 = vadd.s32 128, %v1657_v30 }
 0xd7c   :  { %v835_v50 = vsel %vm834_vm9, %v722_v43, 0  ;;  %v765_v22 = vsel %vm1860_vm1, %v722_v43, 0  ;;  %v904_v39 = vsel %vm903_vm5, %v722_v43, 0  ;;  %vm964_vm9 = vcmp.eq.f32.partialorder %v1772_v47, %v963_v1 }
 0xd7d   :  { %v836_v48 = vsel %vm15_vm0, %v835_v50, 0  ;;  %v766_v53 = vsel %vm15_vm0, %v765_v22, 0  ;;  %v905_v33 = vsel %vm15_vm0, %v904_v39, 0  ;;  %v965_v24 = vsel %vm964_vm9, %v960_v20, inf }
 0xd7e   :  { %v838_v54 = vshrl.u32 %v836_v48, 16  ;;  %v768_v36 = vshrl.u32 %v766_v53, 16  ;;  %v907_v0 = vshrl.u32 %v905_v33, 16  ;;  %v767_v40 = vand.u32 65535, %v766_v53 }
 0xd7f   :  { %v837_v17 = vand.u32 65535, %v836_v48  ;;  %v906_v37 = vand.u32 65535, %v905_v33  ;;  %v918_v53 = vadd.s32 128, %v1716_v62  ;;  %v969_v33 = vcvt.f32.s32 %v963_v1 }
 0xd80   :  { %v840_v35 = vcvt.s32.f32 %v838_v54  ;;  %v770_v25 = vcvt.s32.f32 %v768_v36  ;;  %v909_v27 = vcvt.s32.f32 %v907_v0  ;;  %v769_v38 = vcvt.s32.f32 %v767_v40 }
 0xd81   :  { %v839_v34 = vcvt.s32.f32 %v837_v17  ;;  %v908_v4 = vcvt.s32.f32 %v906_v37 }
 0xd82   :  { %843 = vadd.xlane.f32.xlu0 %v840_v35  ;;  %773 = vadd.xlane.f32.xlu1 %v770_v25  ;;  %v970_v35 = vshll.u32 %v969_v33, 16 }
 0xd86   :  { %912 = vadd.xlane.f32.xlu0 %v909_v27  ;;  %771 = vadd.xlane.f32.xlu1 %v769_v38 }
 0xd8a   :  { %841 = vadd.xlane.f32.xlu1 %v839_v34  ;;  %966 = vmin.xlane.f32.xlu0 %v965_v24 }
 0xd8e   :  { %910 = vadd.xlane.f32.xlu0 %v908_v4 }
 0xded   :  { %v951_v52 = vpop.xlane.xlu1 %950 }
 0xdee   :  { %v952_v26 = vcvt.f32.s32 %v951_v52 }
 0xdf0   :  { %v955_v56 = vadd.s32 %v954_v19, %v952_v26 }
 0xdf2   :  { %vm972_vm5 = vcmp.eq.s32.totalorder %v1466_v44, %v955_v56 }
 0xdf3   :  { %v973_v29 = vsel %vm972_vm5, %v722_v43, 0 }
 0xdf4   :  { %v974_v13 = vsel %vm15_vm0, %v973_v29, 0 }
 0xdf5   :  { %v976_v47 = vshrl.u32 %v974_v13, 16  ;;  %v975_v18 = vand.u32 65535, %v974_v13 }
 0xdf7   :  { %v978_v58 = vcvt.s32.f32 %v976_v47  ;;  %v977_v31 = vcvt.s32.f32 %v975_v18 }
 0xdf9   :  { %981 = vadd.xlane.f32.xlu1 %v978_v58 }
 0xdfd   :  { %979 = vadd.xlane.f32.xlu1 %v977_v31 }
 0xe0b   :  { %v774_v63 = vpop.xlane.xlu1 %773  ;;  %v844_v14 = vpop.xlane.xlu0 %843 }
 0xe0c   :  { %v776_v59 = vcvt.f32.s32 %v774_v63  ;;  %v846_v6 = vcvt.f32.s32 %v844_v14 }
 0xe0e   :  { %v777_v55 = vshll.u32 %v776_v59, 16  ;;  %v847_v32 = vshll.u32 %v846_v6, 16 }
 0xe0f   :  { %v772_v3 = vpop.xlane.xlu1 %771  ;;  %v913_v10 = vpop.xlane.xlu0 %912 }
 0xe10   :  { %v775_v11 = vcvt.f32.s32 %v772_v3  ;;  %v915_v57 = vcvt.f32.s32 %v913_v10 }
 0xe12   :  { %v778_v49 = vadd.s32 %v777_v55, %v775_v11  ;;  %v916_v22 = vshll.u32 %v915_v57, 16 }
 0xe13   :  { %v842_v42 = vpop.xlane.xlu1 %841  ;;  %v967_v9 = vpop.xlane.xlu0 %966 }
 0xe14   :  { %v845_v60 = vcvt.f32.s32 %v842_v42  ;;  %v781_v2 = vsel %vm1861_vm3, %v778_v49, %v780_v51  ;;  %v968_v54 = vcvt.f32.s32 %v967_v9 }
 0xe15   :  { %v783_v50 = vsel %vm510_vm10, %v781_v2, 0  ;;  %vm1862_vm10 = vmmov %vm1859_vm7 }
 0xe16   :  { %v848_v28 = vadd.s32 %v847_v32, %v845_v60  ;;  %v971_v16 = vadd.s32 %v970_v35, %v968_v54 }
 0xe17   :  { %v911_v43 = vpop.xlane.xlu0 %910 }
 0xe18   :  { %v850_v7 = vsel %vm799_vm14, %v848_v28, %v849_v12  ;;  %v914_v39 = vcvt.f32.s32 %v911_v43  ;;  %v987_v41 = vadd.s32 128, %v971_v16 }
 0xe19   :  { %v852_v48 = vsel %vm580_vm12, %v850_v7, %v783_v50 }
 0xe1a   :  { %v917_v45 = vadd.s32 %v916_v22, %v914_v39 }
 0xe1c   :  { %v919_v46 = vsel %vm868_vm2, %v917_v45, %v918_v53 }
 0xe1d   :  { %v921_v30 = vsel %vm650_vm13, %v919_v46, %v852_v48 }
 0xe82   :  { %v982_v36 = vpop.xlane.xlu1 %981 }
 0xe83   :  { %v984_v15 = vcvt.f32.s32 %v982_v36 }
 0xe85   :  { %v985_v0 = vshll.u32 %v984_v15, 16 }
 0xe86   :  { %v980_v25 = vpop.xlane.xlu1 %979 }
 0xe87   :  { %v983_v40 = vcvt.f32.s32 %v980_v25 }
 0xe89   :  { %v986_v27 = vadd.s32 %v985_v0, %v983_v40 }
 0xe8b   :  { %v988_v62 = vsel %vm937_vm4, %v986_v27, %v987_v41 }
 0xe8c   :  { %v990_v21 = vsel %vm1862_vm10, %v988_v62, %v921_v30 }
 0xe8d   :  { %992 = vst.msk [vmem:[#allocation3] sm:$0xff] %vm15_vm0, %v990_v21 }
 0xe94   :  { %v996_v61 = vld [vmem:[#allocation3] sm:$0xff] }
 0xe95   :  { %997 = vst.msk [vmem:[%s1848_s2] sm:$0xff] %vm15_vm0, %v996_v61 }

</bundles_post_ra>
